<compile_context>
chip_gen: v7x
topology: tpu7x:2x2x1
jax: 0.10.0
libtpu: 0.0.40
codegen_flags: <defaults>
</compile_context>

<pallas_src>
import functools

import jax
import jax.numpy as jnp
from jax.experimental import pallas as pl
from jax.experimental.pallas import tpu as pltpu


def _round_up(x, m):
    return (x + m - 1) // m * m


# ----------------------------------------------------------------------------
# Fused (LayerNorm?) -> matmul -> (+bias) -> (QuickGELU?) -> (+residual) kernel
# ----------------------------------------------------------------------------

def _fused_linear_kernel(*refs, has_ln, has_bias, has_residual, activation):
    idx = 0
    x_ref = refs[idx]; idx += 1
    w_ref = refs[idx]; idx += 1
    if has_ln:
        g_ref = refs[idx]; idx += 1
        lb_ref = refs[idx]; idx += 1
    if has_bias:
        b_ref = refs[idx]; idx += 1
    if has_residual:
        r_ref = refs[idx]; idx += 1
    o_ref = refs[idx]; idx += 1
    acc_ref = refs[idx]

    k_id = pl.program_id(2)

    @pl.when(k_id == 0)
    def _():
        acc_ref[...] = jnp.zeros_like(acc_ref)

    x = x_ref[...]
    if has_ln:
        # LayerNorm fused on the x tile (K is never tiled when LN is fused, so
        # the full feature dim is resident and the statistics are exact).
        xf = x.astype(jnp.float32)
        mean = jnp.mean(xf, axis=-1, keepdims=True)
        var = jnp.mean(jnp.square(xf - mean), axis=-1, keepdims=True)
        inv = jax.lax.rsqrt(var + 1e-5)  # PyTorch LayerNorm default eps
        xf = (xf - mean) * inv * g_ref[...] + lb_ref[...]
        x = xf.astype(jnp.bfloat16)

    acc_ref[...] += jnp.dot(x, w_ref[...], preferred_element_type=jnp.float32)

    @pl.when(k_id == pl.num_programs(2) - 1)
    def _():
        acc = acc_ref[...]
        if has_bias:
            acc = acc + b_ref[...]
        if activation == "quick_gelu":
            acc = acc * jax.nn.sigmoid(1.702 * acc)
        if has_residual:
            acc = acc + r_ref[...].astype(jnp.float32)
        o_ref[...] = acc.astype(o_ref.dtype)


def fused_linear(x, w, b=None, *, ln_g=None, ln_b=None, residual=None,
                 activation="none", out_dtype=jnp.bfloat16,
                 block_m=256, block_n=256, block_k=512):
    """y = [QuickGELU]( LN?(x) @ w + b ) + residual?   (f32 accumulation).

    x: (M, K), w: (K, N), b: (N,), residual: (M, N).  Operands are cast to
    bf16; dims are zero-padded to tile-friendly sizes and sliced afterwards.
    """
    M, K = x.shape
    K2, N = w.shape
    assert K2 == K
    has_ln = ln_g is not None
    has_bias = b is not None
    has_res = residual is not None

    bm = min(block_m, _round_up(M, 8))
    bn = min(block_n, _round_up(N, 128))
    # When LayerNorm is fused the full K must live in one block (stats need the
    # whole row); that is fine for ViT widths (<= ~1-2k).  Otherwise tile K.
    if has_ln or K <= block_k:
        bk = K
    else:
        bk = block_k
    M_pad = _round_up(M, bm)
    N_pad = _round_up(N, bn)
    K_pad = _round_up(K, bk)

    xc = x.astype(jnp.bfloat16)
    wc = w.astype(jnp.bfloat16)
    if M_pad != M or K_pad != K:
        xc = jnp.pad(xc, ((0, M_pad - M), (0, K_pad - K)))
    if K_pad != K or N_pad != N:
        wc = jnp.pad(wc, ((0, K_pad - K), (0, N_pad - N)))

    in_specs = [
        pl.BlockSpec((bm, bk), lambda i, j, k: (i, k)),
        pl.BlockSpec((bk, bn), lambda i, j, k: (k, j)),
    ]
    args = [xc, wc]
    if has_ln:
        args.append(ln_g.reshape(1, K).astype(jnp.float32))
        args.append(ln_b.reshape(1, K).astype(jnp.float32))
        in_specs.append(pl.BlockSpec((1, K), lambda i, j, k: (0, 0)))
        in_specs.append(pl.BlockSpec((1, K), lambda i, j, k: (0, 0)))
    if has_bias:
        b2 = b.reshape(1, N).astype(jnp.float32)
        if N_pad != N:
            b2 = jnp.pad(b2, ((0, 0), (0, N_pad - N)))
        in_specs.append(pl.BlockSpec((1, bn), lambda i, j, k: (0, j)))
        args.append(b2)
    if has_res:
        rc = residual.astype(jnp.bfloat16)
        if M_pad != M or N_pad != N:
            rc = jnp.pad(rc, ((0, M_pad - M), (0, N_pad - N)))
        in_specs.append(pl.BlockSpec((bm, bn), lambda i, j, k: (i, j)))
        args.append(rc)

    out = pl.pallas_call(
        functools.partial(_fused_linear_kernel, has_ln=has_ln, has_bias=has_bias,
                          has_residual=has_res, activation=activation),
        out_shape=jax.ShapeDtypeStruct((M_pad, N_pad), out_dtype),
        grid=(M_pad // bm, N_pad // bn, K_pad // bk),
        in_specs=in_specs,
        out_specs=pl.BlockSpec((bm, bn), lambda i, j, k: (i, j)),
        scratch_shapes=[pltpu.VMEM((bm, bn), jnp.float32)],
        compiler_params=pltpu.CompilerParams(
            dimension_semantics=("parallel", "parallel", "arbitrary"),
            vmem_limit_bytes=32 * 1024 * 1024),
    )(*args)
    if M_pad != M or N_pad != N:
        out = out[:M, :N]
    return out


# ----------------------------------------------------------------------------
# Standalone LayerNorm (ln_pre / ln_post-without-proj), tiled over rows
# ----------------------------------------------------------------------------

def _layernorm_kernel(x_ref, g_ref, b_ref, o_ref):
    x = x_ref[...].astype(jnp.float32)
    mean = jnp.mean(x, axis=-1, keepdims=True)
    var = jnp.mean(jnp.square(x - mean), axis=-1, keepdims=True)
    inv = jax.lax.rsqrt(var + 1e-5)
    o_ref[...] = ((x - mean) * inv * g_ref[...] + b_ref[...]).astype(o_ref.dtype)


def layernorm(x, gamma, beta, *, out_dtype=jnp.bfloat16, block_m=512):
    M, C = x.shape
    bm = min(block_m, _round_up(M, 8))
    M_pad = _round_up(M, bm)
    xc = x
    if M_pad != M:
        xc = jnp.pad(xc, ((0, M_pad - M), (0, 0)))
    out = pl.pallas_call(
        _layernorm_kernel,
        out_shape=jax.ShapeDtypeStruct((M_pad, C), out_dtype),
        grid=(M_pad // bm,),
        in_specs=[
            pl.BlockSpec((bm, C), lambda i: (i, 0)),
            pl.BlockSpec((1, C), lambda i: (0, 0)),
            pl.BlockSpec((1, C), lambda i: (0, 0)),
        ],
        out_specs=pl.BlockSpec((bm, C), lambda i: (i, 0)),
        compiler_params=pltpu.CompilerParams(
            dimension_semantics=("parallel",),
            vmem_limit_bytes=32 * 1024 * 1024),
    )(xc, gamma.reshape(1, C).astype(jnp.float32),
      beta.reshape(1, C).astype(jnp.float32))
    if M_pad != M:
        out = out[:M]
    return out


# ----------------------------------------------------------------------------
# Flash-style attention: grid (B, H, q_tiles, kv_tiles), online softmax
# ----------------------------------------------------------------------------

def _flash_attn_kernel(q_ref, k_ref, v_ref, o_ref, m_sc, l_sc, acc_sc, *,
                       scale, kv_len, block_kv):
    ki = pl.program_id(3)

    @pl.when(ki == 0)
    def _():
        m_sc[...] = jnp.full_like(m_sc, -jnp.inf)
        l_sc[...] = jnp.zeros_like(l_sc)
        acc_sc[...] = jnp.zeros_like(acc_sc)

    q = q_ref[0, 0]   # (bq, hd)
    k = k_ref[0, 0]   # (bkv, hd)
    v = v_ref[0, 0]   # (bkv, hd)

    # Contract head_dim directly (no materialized K transpose).
    s = jax.lax.dot_general(q, k, (((1,), (1,)), ((), ())),
                            preferred_element_type=jnp.float32) * scale
    # Mask padded keys.
    kv_idx = ki * block_kv + jax.lax.broadcasted_iota(jnp.int32, s.shape, 1)
    s = jnp.where(kv_idx < kv_len, s, -1e30)

    m_prev = m_sc[...]
    m_new = jnp.maximum(m_prev, jnp.max(s, axis=-1, keepdims=True))
    alpha = jnp.exp(m_prev - m_new)
    p = jnp.exp(s - m_new)
    l_sc[...] = alpha * l_sc[...] + jnp.sum(p, axis=-1, keepdims=True)
    acc_sc[...] = alpha * acc_sc[...] + jnp.dot(
        p.astype(v.dtype), v, preferred_element_type=jnp.float32)
    m_sc[...] = m_new

    @pl.when(ki == pl.num_programs(3) - 1)
    def _():
        o_ref[0, 0] = (acc_sc[...] *
                       pl.reciprocal(l_sc[...], approx=True)).astype(o_ref.dtype)


def flash_attention(q, k, v, *, scale, block_q=128, block_kv=128):
    """q, k, v: (B, H, L, hd) -> (B, H, L, hd)."""
    B, H, L, hd = q.shape
    bt = min(block_q, _round_up(L, 8))
    L_pad = _round_up(L, bt)
    if L_pad != L:
        pad = ((0, 0), (0, 0), (0, L_pad - L), (0, 0))
        q = jnp.pad(q, pad)
        k = jnp.pad(k, pad)
        v = jnp.pad(v, pad)
    q_spec = pl.BlockSpec((1, 1, bt, hd), lambda b, h, qi, ki: (b, h, qi, 0))
    kv_spec = pl.BlockSpec((1, 1, bt, hd), lambda b, h, qi, ki: (b, h, ki, 0))
    out = pl.pallas_call(
        functools.partial(_flash_attn_kernel, scale=scale, kv_len=L, block_kv=bt),
        out_shape=jax.ShapeDtypeStruct((B, H, L_pad, hd), q.dtype),
        grid=(B, H, L_pad // bt, L_pad // bt),
        in_specs=[q_spec, kv_spec, kv_spec],
        out_specs=q_spec,
        scratch_shapes=[
            pltpu.VMEM((bt, 1), jnp.float32),   # running max
            pltpu.VMEM((bt, 1), jnp.float32),   # running denom
            pltpu.VMEM((bt, hd), jnp.float32),  # running numerator
        ],
        compiler_params=pltpu.CompilerParams(
            dimension_semantics=("parallel", "parallel", "parallel", "arbitrary"),
            vmem_limit_bytes=32 * 1024 * 1024),
    )(q, k, v)
    if L_pad != L:
        out = out[:, :, :L, :]
    return out


# ----------------------------------------------------------------------------
# Transformer blocks (glue around Pallas kernels); activations stay bf16
# ----------------------------------------------------------------------------

def multi_head_attention(x_flat, p, num_heads, L, B, C):
    # x_flat: (L*B, C) flattened from the sequence-first (L, B, C) layout.
    hd = C // num_heads
    # ln_1 fused into the QKV projection.
    qkv = fused_linear(x_flat, p["in_proj_w"], p["in_proj_b"],
                       ln_g=p["ln1_g"], ln_b=p["ln1_b"])          # (L*B, 3C)
    qkv = qkv.reshape(L, B, 3, num_heads, hd).transpose(2, 1, 3, 0, 4)  # (3,B,H,L,hd)
    o = flash_attention(qkv[0], qkv[1], qkv[2], scale=1.0 / (hd ** 0.5))
    o = o.transpose(2, 0, 1, 3).reshape(L * B, C)
    # out_proj with fused residual (x + attn(ln_1(x))).
    return fused_linear(o, p["out_proj_w"], p["out_proj_b"], residual=x_flat)


def residual_attention_block(x_flat, p, num_heads, L, B, C):
    # drop_path=0, dropout=0 -> identities.
    x_flat = multi_head_attention(x_flat, p, num_heads, L, B, C)
    # ln_2 fused into c_fc (+ QuickGELU); residual fused into c_proj epilogue.
    h = fused_linear(x_flat, p["fc_w"], p["fc_b"],
                     ln_g=p["ln2_g"], ln_b=p["ln2_b"],
                     activation="quick_gelu")                      # (L*B, 4C)
    x_flat = fused_linear(h, p["cproj_w"], p["cproj_b"], residual=x_flat)
    return x_flat


# ----------------------------------------------------------------------------
# VisionTransformer forward
# ----------------------------------------------------------------------------

def vision_transformer_forward(x, params, cfg):
    # x: (B, 3, T, H_in, W_in)  -- NCDHW, as for PyTorch Conv3d
    B, Cin, T, Hin, Win = x.shape
    ps = cfg["patch_size"]
    kt = cfg["kernel_size"]
    width = cfg["width"]
    Tout, H, W = T // kt, Hin // ps, Win // ps
    N = H * W

    # --- conv1 as patch extraction + fused Pallas matmul (no bias) ---
    xp = x.reshape(B, Cin, Tout, kt, H, ps, W, ps)
    xp = xp.transpose(0, 2, 4, 6, 1, 3, 5, 7)       # (B, Tout, H, W, Cin, kt, ps, ps)
    patches = xp.reshape(B * Tout * N, Cin * kt * ps * ps)
    w_flat = params["conv1_w"].reshape(width, -1).T  # (Cin*kt*ps*ps, width)
    feat = fused_linear(patches, w_flat)             # (B*T*N, width) bf16

    # permute(0,2,3,4,1).reshape(B*T, H*W, C); embedding arithmetic in f32.
    x = feat.astype(jnp.float32).reshape(B * Tout, N, width)

    cls = jnp.broadcast_to(params["class_embedding"].reshape(1, 1, width),
                           (B * Tout, 1, width))
    x = jnp.concatenate([cls, x], axis=1)                 # (B*T, N+1, C)
    x = x + params["positional_embedding"][None]

    cls_tokens = x[:B, :1, :]                             # (B, 1, C)  (as in PyTorch code)
    x = x[:, 1:]                                          # (B*T, N, C)

    # rearrange '(b t) n m -> (b n) t m'
    x = x.reshape(B, Tout, N, width).transpose(0, 2, 1, 3).reshape(B * N, Tout, width)
    if cfg["temp_embed"]:
        tpe = params["temporal_positional_embedding"]     # (1, num_frames, C)
        if Tout == 1:
            x = x + jnp.mean(tpe, axis=1)
        else:
            assert Tout == tpe.shape[1], "temporal embedding expects Tout == num_frames"
            x = x + tpe
    # rearrange '(b n) t m -> b (n t) m'
    x = x.reshape(B, N * Tout, width)

    # masking_prob == 0.0 -> mask_tokens skipped
    x = jnp.concatenate([cls_tokens, x], axis=1)          # (B, L, C), L = N*T+1
    L = x.shape[1]

    # ln_pre (standalone, tiled); then flatten sequence-first (L, B, C) -> (L*B, C)
    x = layernorm(x.reshape(B * L, width), params["ln_pre_g"], params["ln_pre_b"])
    x = x.reshape(B, L, width).transpose(1, 0, 2).reshape(L * B, width)

    for blk in params["blocks"]:
        x = residual_attention_block(x, blk, cfg["heads"], L, B, width)

    if params["proj"] is not None:
        # Only the CLS row feeds the projection; ln_post is row-wise, so it is
        # fused into the projection kernel (dropout is identity at p=0).
        cls_row = x.reshape(L, B, width)[0]               # (B, C)
        out = fused_linear(cls_row, params["proj"],
                           ln_g=params["ln_post_g"], ln_b=params["ln_post_b"],
                           out_dtype=jnp.float32)         # (B, output_dim)
        return out
    else:
        x = layernorm(x, params["ln_post_g"], params["ln_post_b"],
                      out_dtype=jnp.float32)
        return x.reshape(L, B, width).transpose(1, 0, 2)  # (B, L, C)


# ----------------------------------------------------------------------------
# Deterministic parameter init (synthetic; shapes follow the PyTorch __init__,
# except linear weights are stored pre-transposed in (in, out) layout so no
# per-forward HBM relayout of weights is needed).
# ----------------------------------------------------------------------------

def init_params(key, cfg):
    width = cfg["width"]
    ps = cfg["patch_size"]
    kt = cfg["kernel_size"]
    layers = cfg["layers"]
    res = cfg["input_resolution"]
    nf = cfg["num_frames"]
    out_dim = cfg["output_dim"]
    n_patches = (res // ps) ** 2
    scale = width ** -0.5

    keys = iter(jax.random.split(key, 8 + 8 * layers))

    def nrm(shape, s=0.02):
        return s * jax.random.normal(next(keys), shape, jnp.float32)

    params = {
        "conv1_w": nrm((width, 3, kt, ps, ps)),
        "class_embedding": scale * jax.random.normal(next(keys), (width,), jnp.float32),
        "positional_embedding": scale * jax.random.normal(
            next(keys), (n_patches + 1, width), jnp.float32),
        "temporal_positional_embedding": jnp.zeros((1, nf, width), jnp.float32),
        "ln_pre_g": jnp.ones((width,), jnp.float32),
        "ln_pre_b": jnp.zeros((width,), jnp.float32),
        "ln_post_g": jnp.ones((width,), jnp.float32),
        "ln_post_b": jnp.zeros((width,), jnp.float32),
        "proj": (scale * jax.random.normal(next(keys), (width, out_dim), jnp.float32)
                 if out_dim is not None else None),
        "blocks": [],
    }
    for _ in range(layers):
        params["blocks"].append({
            "ln1_g": jnp.ones((width,), jnp.float32),
            "ln1_b": jnp.zeros((width,), jnp.float32),
            "ln2_g": jnp.ones((width,), jnp.float32),
            "ln2_b": jnp.zeros((width,), jnp.float32),
            "in_proj_w": nrm((width, 3 * width)),    # (in, out) = W_in^T
            "in_proj_b": nrm((3 * width,)),
            "out_proj_w": nrm((width, width)),
            "out_proj_b": nrm((width,)),
            "fc_w": nrm((width, 4 * width)),
            "fc_b": nrm((4 * width,)),
            "cproj_w": nrm((4 * width, width)),
            "cproj_b": nrm((width,)),
        })
    return params


# TODO(synk): mask_tokens (masking_prob > 0 path) uses data-dependent random
# gather; not implemented since the default forward uses masking_prob=0.0.

if __name__ == "__main__":
    cfg = dict(
        input_resolution=16,
        patch_size=8,
        width=32,
        layers=2,
        heads=4,
        output_dim=16,
        kernel_size=1,
        num_frames=4,
        temp_embed=True,
    )
    key = jax.random.PRNGKey(0)
    pkey, xkey = jax.random.split(key)
    params = init_params(pkey, cfg)
    x = jax.random.normal(
        xkey, (2, 3, cfg["num_frames"], cfg["input_resolution"], cfg["input_resolution"]),
        jnp.float32)

    fwd = jax.jit(lambda x_, p_: vision_transformer_forward(x_, p_, cfg))
    out = fwd(x, params)
    jax.block_until_ready(out)
    assert out.shape == (2, cfg["output_dim"]), out.shape
    print("KERNEL_OK")
</pallas_src>

<mosaic_0001>
module attributes {stable_mosaic.version = 11 : i64} {
  func.func @_fused_linear_kernel(%arg0: i32, %arg1: i32, %arg2: i32, %arg3: memref<32x192xbf16, #tpu.memory_space<vmem>>, %arg4: memref<192x128xbf16, #tpu.memory_space<vmem>>, %arg5: memref<32x128xbf16, #tpu.memory_space<vmem>>, %arg6: memref<32x128xf32, #tpu.memory_space<vmem>>) attributes {dimension_semantics = [#tpu.dimension_semantics<parallel>, #tpu.dimension_semantics<parallel>, #tpu.dimension_semantics<arbitrary>], iteration_bounds = array<i64: 1, 1, 1>, scalar_prefetch = 0 : i64, scratch_operands = 1 : i64, tpu.core_type = #tpu.core_type<tc>, window_params = [{transform_indices = @transform_0, window_bounds = array<i64: 32, 192>}, {transform_indices = @transform_1, window_bounds = array<i64: 192, 128>}, {transform_indices = @transform_2, window_bounds = array<i64: 32, 128>}]} {
    %c0_i32 = arith.constant 0 : i32
    %0 = arith.cmpi eq, %arg2, %c0_i32 : i32
    %1 = arith.extui %0 : i1 to i32
    %c0_i32_0 = arith.constant 0 : i32
    %2 = arith.cmpi ne, %1, %c0_i32_0 : i32
    scf.if %2 {
      %cst_10 = arith.constant 0.000000e+00 : f32
      %12 = vector.broadcast %cst_10 : f32 to vector<32x128xf32>
      %c0_11 = arith.constant 0 : index
      %c0_12 = arith.constant 0 : index
      %13 = vector.load %arg6[%c0_11, %c0_12] : memref<32x128xf32, #tpu.memory_space<vmem>>, vector<32x128xf32>
      tpu.vector_store %arg6[%c0_11, %c0_12], %12 {strides = array<i32>} : memref<32x128xf32, #tpu.memory_space<vmem>>, vector<32x128xf32>,
    } else {
    }
    %c0 = arith.constant 0 : index
    %c0_1 = arith.constant 0 : index
    %3 = vector.load %arg3[%c0, %c0_1] : memref<32x192xbf16, #tpu.memory_space<vmem>>, vector<32x192xbf16>
    %c0_2 = arith.constant 0 : index
    %c0_3 = arith.constant 0 : index
    %4 = vector.load %arg6[%c0_2, %c0_3] : memref<32x128xf32, #tpu.memory_space<vmem>>, vector<32x128xf32>
    %c0_4 = arith.constant 0 : index
    %c0_5 = arith.constant 0 : index
    %5 = vector.load %arg4[%c0_4, %c0_5] : memref<192x128xbf16, #tpu.memory_space<vmem>>, vector<192x128xbf16>
    %cst = arith.constant dense<0.000000e+00> : vector<32x128xf32>
    %6 = tpu.matmul %3, %5, %cst {dimension_numbers = #tpu.dot_dimension_numbers<[1], [0], [0], [1], [0, 0, 1, 1], [], []>} : vector<32x192xbf16>, vector<192x128xbf16>, vector<32x128xf32> -> vector<32x128xf32>
    %7 = arith.addf %4, %6 : vector<32x128xf32>
    %c0_6 = arith.constant 0 : index
    %c0_7 = arith.constant 0 : index
    %8 = vector.load %arg6[%c0_6, %c0_7] : memref<32x128xf32, #tpu.memory_space<vmem>>, vector<32x128xf32>
    tpu.vector_store %arg6[%c0_6, %c0_7], %7 {strides = array<i32>} : memref<32x128xf32, #tpu.memory_space<vmem>>, vector<32x128xf32>,
    %c0_i32_8 = arith.constant 0 : i32
    %9 = arith.cmpi eq, %arg2, %c0_i32_8 : i32
    %10 = arith.extui %9 : i1 to i32
    %c0_i32_9 = arith.constant 0 : i32
    %11 = arith.cmpi ne, %10, %c0_i32_9 : i32
    scf.if %11 {
      %c0_10 = arith.constant 0 : index
      %c0_11 = arith.constant 0 : index
      %12 = vector.load %arg6[%c0_10, %c0_11] : memref<32x128xf32, #tpu.memory_space<vmem>>, vector<32x128xf32>
      %13 = arith.truncf %12 : vector<32x128xf32> to vector<32x128xbf16>
      %c0_12 = arith.constant 0 : index
      %c0_13 = arith.constant 0 : index
      %14 = vector.load %arg5[%c0_12, %c0_13] : memref<32x128xbf16, #tpu.memory_space<vmem>>, vector<32x128xbf16>
      tpu.vector_store %arg5[%c0_12, %c0_13], %13 {strides = array<i32>} : memref<32x128xbf16, #tpu.memory_space<vmem>>, vector<32x128xbf16>,
    } else {
    }
    return
  }
  func.func @transform_0(%arg0: i32, %arg1: i32, %arg2: i32) -> (i32, i32) {
    %c0_i32 = arith.constant 0 : i32
    return %arg0, %arg2 : i32, i32
  }
  func.func @transform_1(%arg0: i32, %arg1: i32, %arg2: i32) -> (i32, i32) {
    %c0_i32 = arith.constant 0 : i32
    return %arg2, %arg1 : i32, i32
  }
  func.func @transform_2(%arg0: i32, %arg1: i32, %arg2: i32) -> (i32, i32) {
    %c0_i32 = arith.constant 0 : i32
    return %arg0, %arg1 : i32, i32
  }
}

module attributes {stable_mosaic.version = 11 : i64} {
  func.func @_layernorm_kernel(%arg0: i32, %arg1: memref<40x32xf32, #tpu.memory_space<vmem>>, %arg2: memref<1x32xf32, #tpu.memory_space<vmem>>, %arg3: memref<1x32xf32, #tpu.memory_space<vmem>>, %arg4: memref<40x32xbf16, #tpu.memory_space<vmem>>) attributes {dimension_semantics = [#tpu.dimension_semantics<parallel>], iteration_bounds = array<i64: 1>, scalar_prefetch = 0 : i64, scratch_operands = 0 : i64, tpu.core_type = #tpu.core_type<tc>, window_params = [{transform_indices = @transform_0, window_bounds = array<i64: 40, 32>}, {pipeline_mode = #tpu.pipeline_mode<synchronous>, transform_indices = @transform_1, window_bounds = array<i64: 1, 32>}, {pipeline_mode = #tpu.pipeline_mode<synchronous>, transform_indices = @transform_2, window_bounds = array<i64: 1, 32>}, {transform_indices = @transform_3, window_bounds = array<i64: 40, 32>}]} {
    %c0 = arith.constant 0 : index
    %c0_0 = arith.constant 0 : index
    %0 = vector.load %arg1[%c0, %c0_0] : memref<40x32xf32, #tpu.memory_space<vmem>>, vector<40x32xf32>
    %cst = arith.constant dense<0.000000e+00> : vector<40xf32>
    %1 = vector.multi_reduction <add>, %0, %cst [1] : vector<40x32xf32> to vector<40xf32>
    %2 = vector.shape_cast %1 : vector<40xf32> to vector<40x1xf32>
    %cst_1 = arith.constant 3.200000e+01 : f32
    %3 = vector.broadcast %cst_1 : f32 to vector<40x1xf32>
    %4 = arith.divf %2, %3 : vector<40x1xf32>
    %5 = vector.broadcast %4 : vector<40x1xf32> to vector<40x32xf32>
    %6 = arith.subf %0, %5 : vector<40x32xf32>
    %7 = arith.mulf %6, %6 : vector<40x32xf32>
    %cst_2 = arith.constant dense<0.000000e+00> : vector<40xf32>
    %8 = vector.multi_reduction <add>, %7, %cst_2 [1] : vector<40x32xf32> to vector<40xf32>
    %9 = vector.shape_cast %8 : vector<40xf32> to vector<40x1xf32>
    %cst_3 = arith.constant 3.200000e+01 : f32
    %10 = vector.broadcast %cst_3 : f32 to vector<40x1xf32>
    %11 = arith.divf %9, %10 : vector<40x1xf32>
    %cst_4 = arith.constant 9.99999974E-6 : f32
    %12 = vector.broadcast %cst_4 : f32 to vector<40x1xf32>
    %13 = arith.addf %11, %12 : vector<40x1xf32>
    %14 = math.rsqrt %13 : vector<40x1xf32>
    %15 = vector.broadcast %4 : vector<40x1xf32> to vector<40x32xf32>
    %16 = arith.subf %0, %15 : vector<40x32xf32>
    %17 = vector.broadcast %14 : vector<40x1xf32> to vector<40x32xf32>
    %18 = arith.mulf %16, %17 : vector<40x32xf32>
    %c0_5 = arith.constant 0 : index
    %c0_6 = arith.constant 0 : index
    %19 = vector.load %arg2[%c0_5, %c0_6] : memref<1x32xf32, #tpu.memory_space<vmem>>, vector<1x32xf32>
    %20 = vector.broadcast %19 : vector<1x32xf32> to vector<40x32xf32>
    %21 = arith.mulf %18, %20 : vector<40x32xf32>
    %c0_7 = arith.constant 0 : index
    %c0_8 = arith.constant 0 : index
    %22 = vector.load %arg3[%c0_7, %c0_8] : memref<1x32xf32, #tpu.memory_space<vmem>>, vector<1x32xf32>
    %23 = vector.broadcast %22 : vector<1x32xf32> to vector<40x32xf32>
    %24 = arith.addf %21, %23 : vector<40x32xf32>
    %25 = arith.truncf %24 : vector<40x32xf32> to vector<40x32xbf16>
    %c0_9 = arith.constant 0 : index
    %c0_10 = arith.constant 0 : index
    %26 = vector.load %arg4[%c0_9, %c0_10] : memref<40x32xbf16, #tpu.memory_space<vmem>>, vector<40x32xbf16>
    tpu.vector_store %arg4[%c0_9, %c0_10], %25 {strides = array<i32>} : memref<40x32xbf16, #tpu.memory_space<vmem>>, vector<40x32xbf16>,
    return
  }
  func.func @transform_0(%arg0: i32) -> (i32, i32) {
    %c0_i32 = arith.constant 0 : i32
    %c0_i32_0 = arith.constant 0 : i32
    return %arg0, %c0_i32 : i32, i32
  }
  func.func @transform_1(%arg0: i32) -> (i32, i32) {
    %c0_i32 = arith.constant 0 : i32
    %c0_i32_0 = arith.constant 0 : i32
    %c0_i32_1 = arith.constant 0 : i32
    return %c0_i32, %c0_i32_0 : i32, i32
  }
  func.func @transform_2(%arg0: i32) -> (i32, i32) {
    %c0_i32 = arith.constant 0 : i32
    %c0_i32_0 = arith.constant 0 : i32
    %c0_i32_1 = arith.constant 0 : i32
    return %c0_i32, %c0_i32_0 : i32, i32
  }
  func.func @transform_3(%arg0: i32) -> (i32, i32) {
    %c0_i32 = arith.constant 0 : i32
    %c0_i32_0 = arith.constant 0 : i32
    return %arg0, %c0_i32 : i32, i32
  }
}

module attributes {stable_mosaic.version = 11 : i64} {
  func.func @_fused_linear_kernel(%arg0: i32, %arg1: i32, %arg2: i32, %arg3: memref<40x32xbf16, #tpu.memory_space<vmem>>, %arg4: memref<32x128xbf16, #tpu.memory_space<vmem>>, %arg5: memref<1x32xf32, #tpu.memory_space<vmem>>, %arg6: memref<1x32xf32, #tpu.memory_space<vmem>>, %arg7: memref<1x128xf32, #tpu.memory_space<vmem>>, %arg8: memref<40x128xbf16, #tpu.memory_space<vmem>>, %arg9: memref<40x128xf32, #tpu.memory_space<vmem>>) attributes {dimension_semantics = [#tpu.dimension_semantics<parallel>, #tpu.dimension_semantics<parallel>, #tpu.dimension_semantics<arbitrary>], iteration_bounds = array<i64: 1, 1, 1>, scalar_prefetch = 0 : i64, scratch_operands = 1 : i64, tpu.core_type = #tpu.core_type<tc>, window_params = [{transform_indices = @transform_0, window_bounds = array<i64: 40, 32>}, {transform_indices = @transform_1, window_bounds = array<i64: 32, 128>}, {pipeline_mode = #tpu.pipeline_mode<synchronous>, transform_indices = @transform_2, window_bounds = array<i64: 1, 32>}, {pipeline_mode = #tpu.pipeline_mode<synchronous>, transform_indices = @transform_3, window_bounds = array<i64: 1, 32>}, {transform_indices = @transform_4, window_bounds = array<i64: 1, 128>}, {transform_indices = @transform_5, window_bounds = array<i64: 40, 128>}]} {
    %c0_i32 = arith.constant 0 : i32
    %0 = arith.cmpi eq, %arg2, %c0_i32 : i32
    %1 = arith.extui %0 : i1 to i32
    %c0_i32_0 = arith.constant 0 : i32
    %2 = arith.cmpi ne, %1, %c0_i32_0 : i32
    scf.if %2 {
      %cst_19 = arith.constant 0.000000e+00 : f32
      %38 = vector.broadcast %cst_19 : f32 to vector<40x128xf32>
      %c0_20 = arith.constant 0 : index
      %c0_21 = arith.constant 0 : index
      %39 = vector.load %arg9[%c0_20, %c0_21] : memref<40x128xf32, #tpu.memory_space<vmem>>, vector<40x128xf32>
      tpu.vector_store %arg9[%c0_20, %c0_21], %38 {strides = array<i32>} : memref<40x128xf32, #tpu.memory_space<vmem>>, vector<40x128xf32>,
    } else {
    }
    %c0 = arith.constant 0 : index
    %c0_1 = arith.constant 0 : index
    %3 = vector.load %arg3[%c0, %c0_1] : memref<40x32xbf16, #tpu.memory_space<vmem>>, vector<40x32xbf16>
    %4 = arith.extf %3 : vector<40x32xbf16> to vector<40x32xf32>
    %cst = arith.constant dense<0.000000e+00> : vector<40xf32>
    %5 = vector.multi_reduction <add>, %4, %cst [1] : vector<40x32xf32> to vector<40xf32>
    %6 = vector.shape_cast %5 : vector<40xf32> to vector<40x1xf32>
    %cst_2 = arith.constant 3.200000e+01 : f32
    %7 = vector.broadcast %cst_2 : f32 to vector<40x1xf32>
    %8 = arith.divf %6, %7 : vector<40x1xf32>
    %9 = vector.broadcast %8 : vector<40x1xf32> to vector<40x32xf32>
    %10 = arith.subf %4, %9 : vector<40x32xf32>
    %11 = arith.mulf %10, %10 : vector<40x32xf32>
    %cst_3 = arith.constant dense<0.000000e+00> : vector<40xf32>
    %12 = vector.multi_reduction <add>, %11, %cst_3 [1] : vector<40x32xf32> to vector<40xf32>
    %13 = vector.shape_cast %12 : vector<40xf32> to vector<40x1xf32>
    %cst_4 = arith.constant 3.200000e+01 : f32
    %14 = vector.broadcast %cst_4 : f32 to vector<40x1xf32>
    %15 = arith.divf %13, %14 : vector<40x1xf32>
    %cst_5 = arith.constant 9.99999974E-6 : f32
    %16 = vector.broadcast %cst_5 : f32 to vector<40x1xf32>
    %17 = arith.addf %15, %16 : vector<40x1xf32>
    %18 = math.rsqrt %17 : vector<40x1xf32>
    %19 = vector.broadcast %8 : vector<40x1xf32> to vector<40x32xf32>
    %20 = arith.subf %4, %19 : vector<40x32xf32>
    %21 = vector.broadcast %18 : vector<40x1xf32> to vector<40x32xf32>
    %22 = arith.mulf %20, %21 : vector<40x32xf32>
    %c0_6 = arith.constant 0 : index
    %c0_7 = arith.constant 0 : index
    %23 = vector.load %arg5[%c0_6, %c0_7] : memref<1x32xf32, #tpu.memory_space<vmem>>, vector<1x32xf32>
    %24 = vector.broadcast %23 : vector<1x32xf32> to vector<40x32xf32>
    %25 = arith.mulf %22, %24 : vector<40x32xf32>
    %c0_8 = arith.constant 0 : index
    %c0_9 = arith.constant 0 : index
    %26 = vector.load %arg6[%c0_8, %c0_9] : memref<1x32xf32, #tpu.memory_space<vmem>>, vector<1x32xf32>
    %27 = vector.broadcast %26 : vector<1x32xf32> to vector<40x32xf32>
    %28 = arith.addf %25, %27 : vector<40x32xf32>
    %29 = arith.truncf %28 : vector<40x32xf32> to vector<40x32xbf16>
    %c0_10 = arith.constant 0 : index
    %c0_11 = arith.constant 0 : index
    %30 = vector.load %arg9[%c0_10, %c0_11] : memref<40x128xf32, #tpu.memory_space<vmem>>, vector<40x128xf32>
    %c0_12 = arith.constant 0 : index
    %c0_13 = arith.constant 0 : index
    %31 = vector.load %arg4[%c0_12, %c0_13] : memref<32x128xbf16, #tpu.memory_space<vmem>>, vector<32x128xbf16>
    %cst_14 = arith.constant dense<0.000000e+00> : vector<40x128xf32>
    %32 = tpu.matmul %29, %31, %cst_14 {dimension_numbers = #tpu.dot_dimension_numbers<[1], [0], [0], [1], [0, 0, 1, 1], [], []>} : vector<40x32xbf16>, vector<32x128xbf16>, vector<40x128xf32> -> vector<40x128xf32>
    %33 = arith.addf %30, %32 : vector<40x128xf32>
    %c0_15 = arith.constant 0 : index
    %c0_16 = arith.constant 0 : index
    %34 = vector.load %arg9[%c0_15, %c0_16] : memref<40x128xf32, #tpu.memory_space<vmem>>, vector<40x128xf32>
    tpu.vector_store %arg9[%c0_15, %c0_16], %33 {strides = array<i32>} : memref<40x128xf32, #tpu.memory_space<vmem>>, vector<40x128xf32>,
    %c0_i32_17 = arith.constant 0 : i32
    %35 = arith.cmpi eq, %arg2, %c0_i32_17 : i32
    %36 = arith.extui %35 : i1 to i32
    %c0_i32_18 = arith.constant 0 : i32
    %37 = arith.cmpi ne, %36, %c0_i32_18 : i32
    scf.if %37 {
      %c0_19 = arith.constant 0 : index
      %c0_20 = arith.constant 0 : index
      %38 = vector.load %arg9[%c0_19, %c0_20] : memref<40x128xf32, #tpu.memory_space<vmem>>, vector<40x128xf32>
      %c0_21 = arith.constant 0 : index
      %c0_22 = arith.constant 0 : index
      %39 = vector.load %arg7[%c0_21, %c0_22] : memref<1x128xf32, #tpu.memory_space<vmem>>, vector<1x128xf32>
      %40 = vector.broadcast %39 : vector<1x128xf32> to vector<40x128xf32>
      %41 = arith.addf %38, %40 : vector<40x128xf32>
      %42 = arith.truncf %41 : vector<40x128xf32> to vector<40x128xbf16>
      %c0_23 = arith.constant 0 : index
      %c0_24 = arith.constant 0 : index
      %43 = vector.load %arg8[%c0_23, %c0_24] : memref<40x128xbf16, #tpu.memory_space<vmem>>, vector<40x128xbf16>
      tpu.vector_store %arg8[%c0_23, %c0_24], %42 {strides = array<i32>} : memref<40x128xbf16, #tpu.memory_space<vmem>>, vector<40x128xbf16>,
    } else {
    }
    return
  }
  func.func @transform_0(%arg0: i32, %arg1: i32, %arg2: i32) -> (i32, i32) {
    %c0_i32 = arith.constant 0 : i32
    return %arg0, %arg2 : i32, i32
  }
  func.func @transform_1(%arg0: i32, %arg1: i32, %arg2: i32) -> (i32, i32) {
    %c0_i32 = arith.constant 0 : i32
    return %arg2, %arg1 : i32, i32
  }
  func.func @transform_2(%arg0: i32, %arg1: i32, %arg2: i32) -> (i32, i32) {
    %c0_i32 = arith.constant 0 : i32
    %c0_i32_0 = arith.constant 0 : i32
    %c0_i32_1 = arith.constant 0 : i32
    return %c0_i32, %c0_i32_0 : i32, i32
  }
  func.func @transform_3(%arg0: i32, %arg1: i32, %arg2: i32) -> (i32, i32) {
    %c0_i32 = arith.constant 0 : i32
    %c0_i32_0 = arith.constant 0 : i32
    %c0_i32_1 = arith.constant 0 : i32
    return %c0_i32, %c0_i32_0 : i32, i32
  }
  func.func @transform_4(%arg0: i32, %arg1: i32, %arg2: i32) -> (i32, i32) {
    %c0_i32 = arith.constant 0 : i32
    %c0_i32_0 = arith.constant 0 : i32
    return %c0_i32, %arg1 : i32, i32
  }
  func.func @transform_5(%arg0: i32, %arg1: i32, %arg2: i32) -> (i32, i32) {
    %c0_i32 = arith.constant 0 : i32
    return %arg0, %arg1 : i32, i32
  }
}

module attributes {stable_mosaic.version = 11 : i64} {
  func.func @_flash_attn_kernel(%arg0: i32, %arg1: i32, %arg2: i32, %arg3: i32, %arg4: memref<1x1x24x8xbf16, #tpu.memory_space<vmem>>, %arg5: memref<1x1x24x8xbf16, #tpu.memory_space<vmem>>, %arg6: memref<1x1x24x8xbf16, #tpu.memory_space<vmem>>, %arg7: memref<1x1x24x8xbf16, #tpu.memory_space<vmem>>, %arg8: memref<24x1xf32, #tpu.memory_space<vmem>>, %arg9: memref<24x1xf32, #tpu.memory_space<vmem>>, %arg10: memref<24x8xf32, #tpu.memory_space<vmem>>) attributes {dimension_semantics = [#tpu.dimension_semantics<parallel>, #tpu.dimension_semantics<parallel>, #tpu.dimension_semantics<parallel>, #tpu.dimension_semantics<arbitrary>], iteration_bounds = array<i64: 2, 4, 1, 1>, scalar_prefetch = 0 : i64, scratch_operands = 3 : i64, tpu.core_type = #tpu.core_type<tc>, window_params = [{transform_indices = @transform_0, window_bounds = array<i64: 1, 1, 24, 8>}, {transform_indices = @transform_1, window_bounds = array<i64: 1, 1, 24, 8>}, {transform_indices = @transform_2, window_bounds = array<i64: 1, 1, 24, 8>}, {transform_indices = @transform_3, window_bounds = array<i64: 1, 1, 24, 8>}]} {
    %c0_i32 = arith.constant 0 : i32
    %0 = arith.cmpi eq, %arg3, %c0_i32 : i32
    %1 = arith.extui %0 : i1 to i32
    %c0_i32_0 = arith.constant 0 : i32
    %2 = arith.cmpi ne, %1, %c0_i32_0 : i32
    scf.if %2 {
      %cst_31 = arith.constant 0xFF800000 : f32
      %46 = vector.broadcast %cst_31 : f32 to vector<24x1xf32>
      %c0_32 = arith.constant 0 : index
      %c0_33 = arith.constant 0 : index
      %47 = vector.load %arg8[%c0_32, %c0_33] : memref<24x1xf32, #tpu.memory_space<vmem>>, vector<24x1xf32>
      tpu.vector_store %arg8[%c0_32, %c0_33], %46 {strides = array<i32>} : memref<24x1xf32, #tpu.memory_space<vmem>>, vector<24x1xf32>,
      %cst_34 = arith.constant 0.000000e+00 : f32
      %48 = vector.broadcast %cst_34 : f32 to vector<24x1xf32>
      %c0_35 = arith.constant 0 : index
      %c0_36 = arith.constant 0 : index
      %49 = vector.load %arg9[%c0_35, %c0_36] : memref<24x1xf32, #tpu.memory_space<vmem>>, vector<24x1xf32>
      tpu.vector_store %arg9[%c0_35, %c0_36], %48 {strides = array<i32>} : memref<24x1xf32, #tpu.memory_space<vmem>>, vector<24x1xf32>,
      %cst_37 = arith.constant 0.000000e+00 : f32
      %50 = vector.broadcast %cst_37 : f32 to vector<24x8xf32>
      %c0_38 = arith.constant 0 : index
      %c0_39 = arith.constant 0 : index
      %51 = vector.load %arg10[%c0_38, %c0_39] : memref<24x8xf32, #tpu.memory_space<vmem>>, vector<24x8xf32>
      tpu.vector_store %arg10[%c0_38, %c0_39], %50 {strides = array<i32>} : memref<24x8xf32, #tpu.memory_space<vmem>>, vector<24x8xf32>,
    } else {
    }
    %c0 = arith.constant 0 : index
    %c0_1 = arith.constant 0 : index
    %c0_2 = arith.constant 0 : index
    %c0_3 = arith.constant 0 : index
    %3 = vector.load %arg4[%c0, %c0_1, %c0_2, %c0_3] : memref<1x1x24x8xbf16, #tpu.memory_space<vmem>>, vector<1x1x24x8xbf16>
    %4 = vector.shape_cast %3 : vector<1x1x24x8xbf16> to vector<24x8xbf16>
    %c0_4 = arith.constant 0 : index
    %c0_5 = arith.constant 0 : index
    %c0_6 = arith.constant 0 : index
    %c0_7 = arith.constant 0 : index
    %5 = vector.load %arg5[%c0_4, %c0_5, %c0_6, %c0_7] : memref<1x1x24x8xbf16, #tpu.memory_space<vmem>>, vector<1x1x24x8xbf16>
    %6 = vector.shape_cast %5 : vector<1x1x24x8xbf16> to vector<24x8xbf16>
    %c0_8 = arith.constant 0 : index
    %c0_9 = arith.constant 0 : index
    %c0_10 = arith.constant 0 : index
    %c0_11 = arith.constant 0 : index
    %7 = vector.load %arg6[%c0_8, %c0_9, %c0_10, %c0_11] : memref<1x1x24x8xbf16, #tpu.memory_space<vmem>>, vector<1x1x24x8xbf16>
    %8 = vector.shape_cast %7 : vector<1x1x24x8xbf16> to vector<24x8xbf16>
    %cst = arith.constant dense<0.000000e+00> : vector<24x24xf32>
    %9 = tpu.matmul %4, %6, %cst {dimension_numbers = #tpu.dot_dimension_numbers<[1], [1], [0], [0], [0, 0, 1, 0], [], []>} : vector<24x8xbf16>, vector<24x8xbf16>, vector<24x24xf32> -> vector<24x24xf32>
    %cst_12 = arith.constant 0.353553385 : f32
    %10 = vector.broadcast %cst_12 : f32 to vector<24x24xf32>
    %11 = arith.mulf %9, %10 : vector<24x24xf32>
    %c24_i32 = arith.constant 24 : i32
    %12 = arith.muli %arg3, %c24_i32 : i32
    %13 = tpu.iota {dimensions = array<i32: 1>} : vector<24x24xi32>
    %14 = vector.broadcast %12 : i32 to vector<24x24xi32>
    %15 = arith.addi %14, %13 : vector<24x24xi32>
    %c17_i32 = arith.constant 17 : i32
    %16 = vector.broadcast %c17_i32 : i32 to vector<24x24xi32>
    %17 = arith.cmpi slt, %15, %16 : vector<24x24xi32>
    %cst_13 = arith.constant -1.000000e+30 : f32
    %18 = vector.broadcast %cst_13 : f32 to vector<24x24xf32>
    %19 = arith.select %17, %11, %18 : vector<24x24xi1>, vector<24x24xf32>
    %c0_14 = arith.constant 0 : index
    %c0_15 = arith.constant 0 : index
    %20 = vector.load %arg8[%c0_14, %c0_15] : memref<24x1xf32, #tpu.memory_space<vmem>>, vector<24x1xf32>
    %cst_16 = arith.constant dense<0xFF800000> : vector<24xf32>
    %21 = vector.multi_reduction <maximumf>, %19, %cst_16 [1] : vector<24x24xf32> to vector<24xf32>
    %22 = vector.shape_cast %21 : vector<24xf32> to vector<24x1xf32>
    %23 = arith.maximumf %20, %22 : vector<24x1xf32>
    %24 = arith.subf %20, %23 : vector<24x1xf32>
    %25 = math.exp %24 : vector<24x1xf32>
    %26 = vector.broadcast %23 : vector<24x1xf32> to vector<24x24xf32>
    %27 = arith.subf %19, %26 : vector<24x24xf32>
    %28 = math.exp %27 : vector<24x24xf32>
    %c0_17 = arith.constant 0 : index
    %c0_18 = arith.constant 0 : index
    %29 = vector.load %arg9[%c0_17, %c0_18] : memref<24x1xf32, #tpu.memory_space<vmem>>, vector<24x1xf32>
    %30 = arith.mulf %25, %29 : vector<24x1xf32>
    %cst_19 = arith.constant dense<0.000000e+00> : vector<24xf32>
    %31 = vector.multi_reduction <add>, %28, %cst_19 [1] : vector<24x24xf32> to vector<24xf32>
    %32 = vector.shape_cast %31 : vector<24xf32> to vector<24x1xf32>
    %33 = arith.addf %30, %32 : vector<24x1xf32>
    %c0_20 = arith.constant 0 : index
    %c0_21 = arith.constant 0 : index
    %34 = vector.load %arg9[%c0_20, %c0_21] : memref<24x1xf32, #tpu.memory_space<vmem>>, vector<24x1xf32>
    tpu.vector_store %arg9[%c0_20, %c0_21], %33 {strides = array<i32>} : memref<24x1xf32, #tpu.memory_space<vmem>>, vector<24x1xf32>,
    %c0_22 = arith.constant 0 : index
    %c0_23 = arith.constant 0 : index
    %35 = vector.load %arg10[%c0_22, %c0_23] : memref<24x8xf32, #tpu.memory_space<vmem>>, vector<24x8xf32>
    %36 = vector.broadcast %25 : vector<24x1xf32> to vector<24x8xf32>
    %37 = arith.mulf %36, %35 : vector<24x8xf32>
    %38 = arith.truncf %28 : vector<24x24xf32> to vector<24x24xbf16>
    %cst_24 = arith.constant dense<0.000000e+00> : vector<24x8xf32>
    %39 = tpu.matmul %38, %8, %cst_24 {dimension_numbers = #tpu.dot_dimension_numbers<[1], [0], [0], [1], [0, 0, 1, 1], [], []>} : vector<24x24xbf16>, vector<24x8xbf16>, vector<24x8xf32> -> vector<24x8xf32>
    %40 = arith.addf %37, %39 : vector<24x8xf32>
    %c0_25 = arith.constant 0 : index
    %c0_26 = arith.constant 0 : index
    %41 = vector.load %arg10[%c0_25, %c0_26] : memref<24x8xf32, #tpu.memory_space<vmem>>, vector<24x8xf32>
    tpu.vector_store %arg10[%c0_25, %c0_26], %40 {strides = array<i32>} : memref<24x8xf32, #tpu.memory_space<vmem>>, vector<24x8xf32>,
    %c0_27 = arith.constant 0 : index
    %c0_28 = arith.constant 0 : index
    %42 = vector.load %arg8[%c0_27, %c0_28] : memref<24x1xf32, #tpu.memory_space<vmem>>, vector<24x1xf32>
    tpu.vector_store %arg8[%c0_27, %c0_28], %23 {strides = array<i32>} : memref<24x1xf32, #tpu.memory_space<vmem>>, vector<24x1xf32>,
    %c0_i32_29 = arith.constant 0 : i32
    %43 = arith.cmpi eq, %arg3, %c0_i32_29 : i32
    %44 = arith.extui %43 : i1 to i32
    %c0_i32_30 = arith.constant 0 : i32
    %45 = arith.cmpi ne, %44, %c0_i32_30 : i32
    scf.if %45 {
      %c0_31 = arith.constant 0 : index
      %c0_32 = arith.constant 0 : index
      %46 = vector.load %arg10[%c0_31, %c0_32] : memref<24x8xf32, #tpu.memory_space<vmem>>, vector<24x8xf32>
      %c0_33 = arith.constant 0 : index
      %c0_34 = arith.constant 0 : index
      %47 = vector.load %arg9[%c0_33, %c0_34] : memref<24x1xf32, #tpu.memory_space<vmem>>, vector<24x1xf32>
      %48 = tpu.reciprocal %47 {approx = true} : vector<24x1xf32> -> vector<24x1xf32>
      %49 = vector.broadcast %48 : vector<24x1xf32> to vector<24x8xf32>
      %50 = arith.mulf %46, %49 : vector<24x8xf32>
      %51 = arith.truncf %50 : vector<24x8xf32> to vector<24x8xbf16>
      %c0_35 = arith.constant 0 : index
      %c0_36 = arith.constant 0 : index
      %c0_37 = arith.constant 0 : index
      %c0_38 = arith.constant 0 : index
      %52 = vector.load %arg7[%c0_35, %c0_36, %c0_37, %c0_38] : memref<1x1x24x8xbf16, #tpu.memory_space<vmem>>, vector<1x1x24x8xbf16>
      %53 = vector.shape_cast %52 : vector<1x1x24x8xbf16> to vector<24x8xbf16>
      %54 = vector.shape_cast %51 : vector<24x8xbf16> to vector<1x1x24x8xbf16>
      tpu.vector_store %arg7[%c0_35, %c0_36, %c0_37, %c0_38], %54 {strides = array<i32>} : memref<1x1x24x8xbf16, #tpu.memory_space<vmem>>, vector<1x1x24x8xbf16>,
    } else {
    }
    return
  }
  func.func @transform_0(%arg0: i32, %arg1: i32, %arg2: i32, %arg3: i32) -> (i32, i32, i32, i32) {
    %c0_i32 = arith.constant 0 : i32
    %c0_i32_0 = arith.constant 0 : i32
    return %arg0, %arg1, %arg2, %c0_i32 : i32, i32, i32, i32
  }
  func.func @transform_1(%arg0: i32, %arg1: i32, %arg2: i32, %arg3: i32) -> (i32, i32, i32, i32) {
    %c0_i32 = arith.constant 0 : i32
    %c0_i32_0 = arith.constant 0 : i32
    return %arg0, %arg1, %arg3, %c0_i32 : i32, i32, i32, i32
  }
  func.func @transform_2(%arg0: i32, %arg1: i32, %arg2: i32, %arg3: i32) -> (i32, i32, i32, i32) {
    %c0_i32 = arith.constant 0 : i32
    %c0_i32_0 = arith.constant 0 : i32
    return %arg0, %arg1, %arg3, %c0_i32 : i32, i32, i32, i32
  }
  func.func @transform_3(%arg0: i32, %arg1: i32, %arg2: i32, %arg3: i32) -> (i32, i32, i32, i32) {
    %c0_i32 = arith.constant 0 : i32
    %c0_i32_0 = arith.constant 0 : i32
    return %arg0, %arg1, %arg2, %c0_i32 : i32, i32, i32, i32
  }
}

module attributes {stable_mosaic.version = 11 : i64} {
  func.func @_fused_linear_kernel(%arg0: i32, %arg1: i32, %arg2: i32, %arg3: memref<40x32xbf16, #tpu.memory_space<vmem>>, %arg4: memref<32x128xbf16, #tpu.memory_space<vmem>>, %arg5: memref<1x32xf32, #tpu.memory_space<vmem>>, %arg6: memref<1x32xf32, #tpu.memory_space<vmem>>, %arg7: memref<1x128xf32, #tpu.memory_space<vmem>>, %arg8: memref<40x128xbf16, #tpu.memory_space<vmem>>, %arg9: memref<40x128xf32, #tpu.memory_space<vmem>>) attributes {dimension_semantics = [#tpu.dimension_semantics<parallel>, #tpu.dimension_semantics<parallel>, #tpu.dimension_semantics<arbitrary>], iteration_bounds = array<i64: 1, 1, 1>, scalar_prefetch = 0 : i64, scratch_operands = 1 : i64, tpu.core_type = #tpu.core_type<tc>, window_params = [{transform_indices = @transform_0, window_bounds = array<i64: 40, 32>}, {transform_indices = @transform_1, window_bounds = array<i64: 32, 128>}, {pipeline_mode = #tpu.pipeline_mode<synchronous>, transform_indices = @transform_2, window_bounds = array<i64: 1, 32>}, {pipeline_mode = #tpu.pipeline_mode<synchronous>, transform_indices = @transform_3, window_bounds = array<i64: 1, 32>}, {transform_indices = @transform_4, window_bounds = array<i64: 1, 128>}, {transform_indices = @transform_5, window_bounds = array<i64: 40, 128>}]} {
    %c0_i32 = arith.constant 0 : i32
    %0 = arith.cmpi eq, %arg2, %c0_i32 : i32
    %1 = arith.extui %0 : i1 to i32
    %c0_i32_0 = arith.constant 0 : i32
    %2 = arith.cmpi ne, %1, %c0_i32_0 : i32
    scf.if %2 {
      %cst_19 = arith.constant 0.000000e+00 : f32
      %38 = vector.broadcast %cst_19 : f32 to vector<40x128xf32>
      %c0_20 = arith.constant 0 : index
      %c0_21 = arith.constant 0 : index
      %39 = vector.load %arg9[%c0_20, %c0_21] : memref<40x128xf32, #tpu.memory_space<vmem>>, vector<40x128xf32>
      tpu.vector_store %arg9[%c0_20, %c0_21], %38 {strides = array<i32>} : memref<40x128xf32, #tpu.memory_space<vmem>>, vector<40x128xf32>,
    } else {
    }
    %c0 = arith.constant 0 : index
    %c0_1 = arith.constant 0 : index
    %3 = vector.load %arg3[%c0, %c0_1] : memref<40x32xbf16, #tpu.memory_space<vmem>>, vector<40x32xbf16>
    %4 = arith.extf %3 : vector<40x32xbf16> to vector<40x32xf32>
    %cst = arith.constant dense<0.000000e+00> : vector<40xf32>
    %5 = vector.multi_reduction <add>, %4, %cst [1] : vector<40x32xf32> to vector<40xf32>
    %6 = vector.shape_cast %5 : vector<40xf32> to vector<40x1xf32>
    %cst_2 = arith.constant 3.200000e+01 : f32
    %7 = vector.broadcast %cst_2 : f32 to vector<40x1xf32>
    %8 = arith.divf %6, %7 : vector<40x1xf32>
    %9 = vector.broadcast %8 : vector<40x1xf32> to vector<40x32xf32>
    %10 = arith.subf %4, %9 : vector<40x32xf32>
    %11 = arith.mulf %10, %10 : vector<40x32xf32>
    %cst_3 = arith.constant dense<0.000000e+00> : vector<40xf32>
    %12 = vector.multi_reduction <add>, %11, %cst_3 [1] : vector<40x32xf32> to vector<40xf32>
    %13 = vector.shape_cast %12 : vector<40xf32> to vector<40x1xf32>
    %cst_4 = arith.constant 3.200000e+01 : f32
    %14 = vector.broadcast %cst_4 : f32 to vector<40x1xf32>
    %15 = arith.divf %13, %14 : vector<40x1xf32>
    %cst_5 = arith.constant 9.99999974E-6 : f32
    %16 = vector.broadcast %cst_5 : f32 to vector<40x1xf32>
    %17 = arith.addf %15, %16 : vector<40x1xf32>
    %18 = math.rsqrt %17 : vector<40x1xf32>
    %19 = vector.broadcast %8 : vector<40x1xf32> to vector<40x32xf32>
    %20 = arith.subf %4, %19 : vector<40x32xf32>
    %21 = vector.broadcast %18 : vector<40x1xf32> to vector<40x32xf32>
    %22 = arith.mulf %20, %21 : vector<40x32xf32>
    %c0_6 = arith.constant 0 : index
    %c0_7 = arith.constant 0 : index
    %23 = vector.load %arg5[%c0_6, %c0_7] : memref<1x32xf32, #tpu.memory_space<vmem>>, vector<1x32xf32>
    %24 = vector.broadcast %23 : vector<1x32xf32> to vector<40x32xf32>
    %25 = arith.mulf %22, %24 : vector<40x32xf32>
    %c0_8 = arith.constant 0 : index
    %c0_9 = arith.constant 0 : index
    %26 = vector.load %arg6[%c0_8, %c0_9] : memref<1x32xf32, #tpu.memory_space<vmem>>, vector<1x32xf32>
    %27 = vector.broadcast %26 : vector<1x32xf32> to vector<40x32xf32>
    %28 = arith.addf %25, %27 : vector<40x32xf32>
    %29 = arith.truncf %28 : vector<40x32xf32> to vector<40x32xbf16>
    %c0_10 = arith.constant 0 : index
    %c0_11 = arith.constant 0 : index
    %30 = vector.load %arg9[%c0_10, %c0_11] : memref<40x128xf32, #tpu.memory_space<vmem>>, vector<40x128xf32>
    %c0_12 = arith.constant 0 : index
    %c0_13 = arith.constant 0 : index
    %31 = vector.load %arg4[%c0_12, %c0_13] : memref<32x128xbf16, #tpu.memory_space<vmem>>, vector<32x128xbf16>
    %cst_14 = arith.constant dense<0.000000e+00> : vector<40x128xf32>
    %32 = tpu.matmul %29, %31, %cst_14 {dimension_numbers = #tpu.dot_dimension_numbers<[1], [0], [0], [1], [0, 0, 1, 1], [], []>} : vector<40x32xbf16>, vector<32x128xbf16>, vector<40x128xf32> -> vector<40x128xf32>
    %33 = arith.addf %30, %32 : vector<40x128xf32>
    %c0_15 = arith.constant 0 : index
    %c0_16 = arith.constant 0 : index
    %34 = vector.load %arg9[%c0_15, %c0_16] : memref<40x128xf32, #tpu.memory_space<vmem>>, vector<40x128xf32>
    tpu.vector_store %arg9[%c0_15, %c0_16], %33 {strides = array<i32>} : memref<40x128xf32, #tpu.memory_space<vmem>>, vector<40x128xf32>,
    %c0_i32_17 = arith.constant 0 : i32
    %35 = arith.cmpi eq, %arg2, %c0_i32_17 : i32
    %36 = arith.extui %35 : i1 to i32
    %c0_i32_18 = arith.constant 0 : i32
    %37 = arith.cmpi ne, %36, %c0_i32_18 : i32
    scf.if %37 {
      %c0_19 = arith.constant 0 : index
      %c0_20 = arith.constant 0 : index
      %38 = vector.load %arg9[%c0_19, %c0_20] : memref<40x128xf32, #tpu.memory_space<vmem>>, vector<40x128xf32>
      %c0_21 = arith.constant 0 : index
      %c0_22 = arith.constant 0 : index
      %39 = vector.load %arg7[%c0_21, %c0_22] : memref<1x128xf32, #tpu.memory_space<vmem>>, vector<1x128xf32>
      %40 = vector.broadcast %39 : vector<1x128xf32> to vector<40x128xf32>
      %41 = arith.addf %38, %40 : vector<40x128xf32>
      %cst_23 = arith.constant 1.702000e+00 : f32
      %42 = vector.broadcast %cst_23 : f32 to vector<40x128xf32>
      %43 = arith.mulf %42, %41 : vector<40x128xf32>
      %44 = arith.negf %43 : vector<40x128xf32>
      %45 = math.exp %44 : vector<40x128xf32>
      %cst_24 = arith.constant 1.000000e+00 : f32
      %46 = vector.broadcast %cst_24 : f32 to vector<40x128xf32>
      %47 = arith.addf %46, %45 : vector<40x128xf32>
      %48 = arith.divf %46, %47 : vector<40x128xf32>
      %49 = arith.mulf %41, %48 : vector<40x128xf32>
      %50 = arith.truncf %49 : vector<40x128xf32> to vector<40x128xbf16>
      %c0_25 = arith.constant 0 : index
      %c0_26 = arith.constant 0 : index
      %51 = vector.load %arg8[%c0_25, %c0_26] : memref<40x128xbf16, #tpu.memory_space<vmem>>, vector<40x128xbf16>
      tpu.vector_store %arg8[%c0_25, %c0_26], %50 {strides = array<i32>} : memref<40x128xbf16, #tpu.memory_space<vmem>>, vector<40x128xbf16>,
    } else {
    }
    return
  }
  func.func @transform_0(%arg0: i32, %arg1: i32, %arg2: i32) -> (i32, i32) {
    %c0_i32 = arith.constant 0 : i32
    return %arg0, %arg2 : i32, i32
  }
  func.func @transform_1(%arg0: i32, %arg1: i32, %arg2: i32) -> (i32, i32) {
    %c0_i32 = arith.constant 0 : i32
    return %arg2, %arg1 : i32, i32
  }
  func.func @transform_2(%arg0: i32, %arg1: i32, %arg2: i32) -> (i32, i32) {
    %c0_i32 = arith.constant 0 : i32
    %c0_i32_0 = arith.constant 0 : i32
    %c0_i32_1 = arith.constant 0 : i32
    return %c0_i32, %c0_i32_0 : i32, i32
  }
  func.func @transform_3(%arg0: i32, %arg1: i32, %arg2: i32) -> (i32, i32) {
    %c0_i32 = arith.constant 0 : i32
    %c0_i32_0 = arith.constant 0 : i32
    %c0_i32_1 = arith.constant 0 : i32
    return %c0_i32, %c0_i32_0 : i32, i32
  }
  func.func @transform_4(%arg0: i32, %arg1: i32, %arg2: i32) -> (i32, i32) {
    %c0_i32 = arith.constant 0 : i32
    %c0_i32_0 = arith.constant 0 : i32
    return %c0_i32, %arg1 : i32, i32
  }
  func.func @transform_5(%arg0: i32, %arg1: i32, %arg2: i32) -> (i32, i32) {
    %c0_i32 = arith.constant 0 : i32
    return %arg0, %arg1 : i32, i32
  }
}

module attributes {stable_mosaic.version = 11 : i64} {
  func.func @_fused_linear_kernel(%arg0: i32, %arg1: i32, %arg2: i32, %arg3: memref<40x32xbf16, #tpu.memory_space<vmem>>, %arg4: memref<32x128xbf16, #tpu.memory_space<vmem>>, %arg5: memref<1x128xf32, #tpu.memory_space<vmem>>, %arg6: memref<40x128xbf16, #tpu.memory_space<vmem>>, %arg7: memref<40x128xbf16, #tpu.memory_space<vmem>>, %arg8: memref<40x128xf32, #tpu.memory_space<vmem>>) attributes {dimension_semantics = [#tpu.dimension_semantics<parallel>, #tpu.dimension_semantics<parallel>, #tpu.dimension_semantics<arbitrary>], iteration_bounds = array<i64: 1, 1, 1>, scalar_prefetch = 0 : i64, scratch_operands = 1 : i64, tpu.core_type = #tpu.core_type<tc>, window_params = [{transform_indices = @transform_0, window_bounds = array<i64: 40, 32>}, {transform_indices = @transform_1, window_bounds = array<i64: 32, 128>}, {transform_indices = @transform_2, window_bounds = array<i64: 1, 128>}, {transform_indices = @transform_3, window_bounds = array<i64: 40, 128>}, {transform_indices = @transform_4, window_bounds = array<i64: 40, 128>}]} {
    %c0_i32 = arith.constant 0 : i32
    %0 = arith.cmpi eq, %arg2, %c0_i32 : i32
    %1 = arith.extui %0 : i1 to i32
    %c0_i32_0 = arith.constant 0 : i32
    %2 = arith.cmpi ne, %1, %c0_i32_0 : i32
    scf.if %2 {
      %cst_10 = arith.constant 0.000000e+00 : f32
      %12 = vector.broadcast %cst_10 : f32 to vector<40x128xf32>
      %c0_11 = arith.constant 0 : index
      %c0_12 = arith.constant 0 : index
      %13 = vector.load %arg8[%c0_11, %c0_12] : memref<40x128xf32, #tpu.memory_space<vmem>>, vector<40x128xf32>
      tpu.vector_store %arg8[%c0_11, %c0_12], %12 {strides = array<i32>} : memref<40x128xf32, #tpu.memory_space<vmem>>, vector<40x128xf32>,
    } else {
    }
    %c0 = arith.constant 0 : index
    %c0_1 = arith.constant 0 : index
    %3 = vector.load %arg3[%c0, %c0_1] : memref<40x32xbf16, #tpu.memory_space<vmem>>, vector<40x32xbf16>
    %c0_2 = arith.constant 0 : index
    %c0_3 = arith.constant 0 : index
    %4 = vector.load %arg8[%c0_2, %c0_3] : memref<40x128xf32, #tpu.memory_space<vmem>>, vector<40x128xf32>
    %c0_4 = arith.constant 0 : index
    %c0_5 = arith.constant 0 : index
    %5 = vector.load %arg4[%c0_4, %c0_5] : memref<32x128xbf16, #tpu.memory_space<vmem>>, vector<32x128xbf16>
    %cst = arith.constant dense<0.000000e+00> : vector<40x128xf32>
    %6 = tpu.matmul %3, %5, %cst {dimension_numbers = #tpu.dot_dimension_numbers<[1], [0], [0], [1], [0, 0, 1, 1], [], []>} : vector<40x32xbf16>, vector<32x128xbf16>, vector<40x128xf32> -> vector<40x128xf32>
    %7 = arith.addf %4, %6 : vector<40x128xf32>
    %c0_6 = arith.constant 0 : index
    %c0_7 = arith.constant 0 : index
    %8 = vector.load %arg8[%c0_6, %c0_7] : memref<40x128xf32, #tpu.memory_space<vmem>>, vector<40x128xf32>
    tpu.vector_store %arg8[%c0_6, %c0_7], %7 {strides = array<i32>} : memref<40x128xf32, #tpu.memory_space<vmem>>, vector<40x128xf32>,
    %c0_i32_8 = arith.constant 0 : i32
    %9 = arith.cmpi eq, %arg2, %c0_i32_8 : i32
    %10 = arith.extui %9 : i1 to i32
    %c0_i32_9 = arith.constant 0 : i32
    %11 = arith.cmpi ne, %10, %c0_i32_9 : i32
    scf.if %11 {
      %c0_10 = arith.constant 0 : index
      %c0_11 = arith.constant 0 : index
      %12 = vector.load %arg8[%c0_10, %c0_11] : memref<40x128xf32, #tpu.memory_space<vmem>>, vector<40x128xf32>
      %c0_12 = arith.constant 0 : index
      %c0_13 = arith.constant 0 : index
      %13 = vector.load %arg5[%c0_12, %c0_13] : memref<1x128xf32, #tpu.memory_space<vmem>>, vector<1x128xf32>
      %14 = vector.broadcast %13 : vector<1x128xf32> to vector<40x128xf32>
      %15 = arith.addf %12, %14 : vector<40x128xf32>
      %c0_14 = arith.constant 0 : index
      %c0_15 = arith.constant 0 : index
      %16 = vector.load %arg6[%c0_14, %c0_15] : memref<40x128xbf16, #tpu.memory_space<vmem>>, vector<40x128xbf16>
      %17 = arith.extf %16 : vector<40x128xbf16> to vector<40x128xf32>
      %18 = arith.addf %15, %17 : vector<40x128xf32>
      %19 = arith.truncf %18 : vector<40x128xf32> to vector<40x128xbf16>
      %c0_16 = arith.constant 0 : index
      %c0_17 = arith.constant 0 : index
      %20 = vector.load %arg7[%c0_16, %c0_17] : memref<40x128xbf16, #tpu.memory_space<vmem>>, vector<40x128xbf16>
      tpu.vector_store %arg7[%c0_16, %c0_17], %19 {strides = array<i32>} : memref<40x128xbf16, #tpu.memory_space<vmem>>, vector<40x128xbf16>,
    } else {
    }
    return
  }
  func.func @transform_0(%arg0: i32, %arg1: i32, %arg2: i32) -> (i32, i32) {
    %c0_i32 = arith.constant 0 : i32
    return %arg0, %arg2 : i32, i32
  }
  func.func @transform_1(%arg0: i32, %arg1: i32, %arg2: i32) -> (i32, i32) {
    %c0_i32 = arith.constant 0 : i32
    return %arg2, %arg1 : i32, i32
  }
  func.func @transform_2(%arg0: i32, %arg1: i32, %arg2: i32) -> (i32, i32) {
    %c0_i32 = arith.constant 0 : i32
    %c0_i32_0 = arith.constant 0 : i32
    return %c0_i32, %arg1 : i32, i32
  }
  func.func @transform_3(%arg0: i32, %arg1: i32, %arg2: i32) -> (i32, i32) {
    %c0_i32 = arith.constant 0 : i32
    return %arg0, %arg1 : i32, i32
  }
  func.func @transform_4(%arg0: i32, %arg1: i32, %arg2: i32) -> (i32, i32) {
    %c0_i32 = arith.constant 0 : i32
    return %arg0, %arg1 : i32, i32
  }
}

module attributes {stable_mosaic.version = 11 : i64} {
  func.func @_fused_linear_kernel(%arg0: i32, %arg1: i32, %arg2: i32, %arg3: memref<40x128xbf16, #tpu.memory_space<vmem>>, %arg4: memref<128x128xbf16, #tpu.memory_space<vmem>>, %arg5: memref<1x128xf32, #tpu.memory_space<vmem>>, %arg6: memref<40x128xbf16, #tpu.memory_space<vmem>>, %arg7: memref<40x128xbf16, #tpu.memory_space<vmem>>, %arg8: memref<40x128xf32, #tpu.memory_space<vmem>>) attributes {dimension_semantics = [#tpu.dimension_semantics<parallel>, #tpu.dimension_semantics<parallel>, #tpu.dimension_semantics<arbitrary>], iteration_bounds = array<i64: 1, 1, 1>, scalar_prefetch = 0 : i64, scratch_operands = 1 : i64, tpu.core_type = #tpu.core_type<tc>, window_params = [{transform_indices = @transform_0, window_bounds = array<i64: 40, 128>}, {transform_indices = @transform_1, window_bounds = array<i64: 128, 128>}, {transform_indices = @transform_2, window_bounds = array<i64: 1, 128>}, {transform_indices = @transform_3, window_bounds = array<i64: 40, 128>}, {transform_indices = @transform_4, window_bounds = array<i64: 40, 128>}]} {
    %c0_i32 = arith.constant 0 : i32
    %0 = arith.cmpi eq, %arg2, %c0_i32 : i32
    %1 = arith.extui %0 : i1 to i32
    %c0_i32_0 = arith.constant 0 : i32
    %2 = arith.cmpi ne, %1, %c0_i32_0 : i32
    scf.if %2 {
      %cst_10 = arith.constant 0.000000e+00 : f32
      %12 = vector.broadcast %cst_10 : f32 to vector<40x128xf32>
      %c0_11 = arith.constant 0 : index
      %c0_12 = arith.constant 0 : index
      %13 = vector.load %arg8[%c0_11, %c0_12] : memref<40x128xf32, #tpu.memory_space<vmem>>, vector<40x128xf32>
      tpu.vector_store %arg8[%c0_11, %c0_12], %12 {strides = array<i32>} : memref<40x128xf32, #tpu.memory_space<vmem>>, vector<40x128xf32>,
    } else {
    }
    %c0 = arith.constant 0 : index
    %c0_1 = arith.constant 0 : index
    %3 = vector.load %arg3[%c0, %c0_1] : memref<40x128xbf16, #tpu.memory_space<vmem>>, vector<40x128xbf16>
    %c0_2 = arith.constant 0 : index
    %c0_3 = arith.constant 0 : index
    %4 = vector.load %arg8[%c0_2, %c0_3] : memref<40x128xf32, #tpu.memory_space<vmem>>, vector<40x128xf32>
    %c0_4 = arith.constant 0 : index
    %c0_5 = arith.constant 0 : index
    %5 = vector.load %arg4[%c0_4, %c0_5] : memref<128x128xbf16, #tpu.memory_space<vmem>>, vector<128x128xbf16>
    %cst = arith.constant dense<0.000000e+00> : vector<40x128xf32>
    %6 = tpu.matmul %3, %5, %cst {dimension_numbers = #tpu.dot_dimension_numbers<[1], [0], [0], [1], [0, 0, 1, 1], [], []>} : vector<40x128xbf16>, vector<128x128xbf16>, vector<40x128xf32> -> vector<40x128xf32>
    %7 = arith.addf %4, %6 : vector<40x128xf32>
    %c0_6 = arith.constant 0 : index
    %c0_7 = arith.constant 0 : index
    %8 = vector.load %arg8[%c0_6, %c0_7] : memref<40x128xf32, #tpu.memory_space<vmem>>, vector<40x128xf32>
    tpu.vector_store %arg8[%c0_6, %c0_7], %7 {strides = array<i32>} : memref<40x128xf32, #tpu.memory_space<vmem>>, vector<40x128xf32>,
    %c0_i32_8 = arith.constant 0 : i32
    %9 = arith.cmpi eq, %arg2, %c0_i32_8 : i32
    %10 = arith.extui %9 : i1 to i32
    %c0_i32_9 = arith.constant 0 : i32
    %11 = arith.cmpi ne, %10, %c0_i32_9 : i32
    scf.if %11 {
      %c0_10 = arith.constant 0 : index
      %c0_11 = arith.constant 0 : index
      %12 = vector.load %arg8[%c0_10, %c0_11] : memref<40x128xf32, #tpu.memory_space<vmem>>, vector<40x128xf32>
      %c0_12 = arith.constant 0 : index
      %c0_13 = arith.constant 0 : index
      %13 = vector.load %arg5[%c0_12, %c0_13] : memref<1x128xf32, #tpu.memory_space<vmem>>, vector<1x128xf32>
      %14 = vector.broadcast %13 : vector<1x128xf32> to vector<40x128xf32>
      %15 = arith.addf %12, %14 : vector<40x128xf32>
      %c0_14 = arith.constant 0 : index
      %c0_15 = arith.constant 0 : index
      %16 = vector.load %arg6[%c0_14, %c0_15] : memref<40x128xbf16, #tpu.memory_space<vmem>>, vector<40x128xbf16>
      %17 = arith.extf %16 : vector<40x128xbf16> to vector<40x128xf32>
      %18 = arith.addf %15, %17 : vector<40x128xf32>
      %19 = arith.truncf %18 : vector<40x128xf32> to vector<40x128xbf16>
      %c0_16 = arith.constant 0 : index
      %c0_17 = arith.constant 0 : index
      %20 = vector.load %arg7[%c0_16, %c0_17] : memref<40x128xbf16, #tpu.memory_space<vmem>>, vector<40x128xbf16>
      tpu.vector_store %arg7[%c0_16, %c0_17], %19 {strides = array<i32>} : memref<40x128xbf16, #tpu.memory_space<vmem>>, vector<40x128xbf16>,
    } else {
    }
    return
  }
  func.func @transform_0(%arg0: i32, %arg1: i32, %arg2: i32) -> (i32, i32) {
    %c0_i32 = arith.constant 0 : i32
    return %arg0, %arg2 : i32, i32
  }
  func.func @transform_1(%arg0: i32, %arg1: i32, %arg2: i32) -> (i32, i32) {
    %c0_i32 = arith.constant 0 : i32
    return %arg2, %arg1 : i32, i32
  }
  func.func @transform_2(%arg0: i32, %arg1: i32, %arg2: i32) -> (i32, i32) {
    %c0_i32 = arith.constant 0 : i32
    %c0_i32_0 = arith.constant 0 : i32
    return %c0_i32, %arg1 : i32, i32
  }
  func.func @transform_3(%arg0: i32, %arg1: i32, %arg2: i32) -> (i32, i32) {
    %c0_i32 = arith.constant 0 : i32
    return %arg0, %arg1 : i32, i32
  }
  func.func @transform_4(%arg0: i32, %arg1: i32, %arg2: i32) -> (i32, i32) {
    %c0_i32 = arith.constant 0 : i32
    return %arg0, %arg1 : i32, i32
  }
}

module attributes {stable_mosaic.version = 11 : i64} {
  func.func @_fused_linear_kernel(%arg0: i32, %arg1: i32, %arg2: i32, %arg3: memref<8x32xbf16, #tpu.memory_space<vmem>>, %arg4: memref<32x128xbf16, #tpu.memory_space<vmem>>, %arg5: memref<1x32xf32, #tpu.memory_space<vmem>>, %arg6: memref<1x32xf32, #tpu.memory_space<vmem>>, %arg7: memref<8x128xf32, #tpu.memory_space<vmem>>, %arg8: memref<8x128xf32, #tpu.memory_space<vmem>>) attributes {dimension_semantics = [#tpu.dimension_semantics<parallel>, #tpu.dimension_semantics<parallel>, #tpu.dimension_semantics<arbitrary>], iteration_bounds = array<i64: 1, 1, 1>, scalar_prefetch = 0 : i64, scratch_operands = 1 : i64, tpu.core_type = #tpu.core_type<tc>, window_params = [{transform_indices = @transform_0, window_bounds = array<i64: 8, 32>}, {transform_indices = @transform_1, window_bounds = array<i64: 32, 128>}, {pipeline_mode = #tpu.pipeline_mode<synchronous>, transform_indices = @transform_2, window_bounds = array<i64: 1, 32>}, {pipeline_mode = #tpu.pipeline_mode<synchronous>, transform_indices = @transform_3, window_bounds = array<i64: 1, 32>}, {transform_indices = @transform_4, window_bounds = array<i64: 8, 128>}]} {
    %c0_i32 = arith.constant 0 : i32
    %0 = arith.cmpi eq, %arg2, %c0_i32 : i32
    %1 = arith.extui %0 : i1 to i32
    %c0_i32_0 = arith.constant 0 : i32
    %2 = arith.cmpi ne, %1, %c0_i32_0 : i32
    scf.if %2 {
      %cst_19 = arith.constant 0.000000e+00 : f32
      %38 = vector.broadcast %cst_19 : f32 to vector<8x128xf32>
      %c0_20 = arith.constant 0 : index
      %c0_21 = arith.constant 0 : index
      %39 = vector.load %arg8[%c0_20, %c0_21] : memref<8x128xf32, #tpu.memory_space<vmem>>, vector<8x128xf32>
      tpu.vector_store %arg8[%c0_20, %c0_21], %38 {strides = array<i32>} : memref<8x128xf32, #tpu.memory_space<vmem>>, vector<8x128xf32>,
    } else {
    }
    %c0 = arith.constant 0 : index
    %c0_1 = arith.constant 0 : index
    %3 = vector.load %arg3[%c0, %c0_1] : memref<8x32xbf16, #tpu.memory_space<vmem>>, vector<8x32xbf16>
    %4 = arith.extf %3 : vector<8x32xbf16> to vector<8x32xf32>
    %cst = arith.constant dense<0.000000e+00> : vector<8xf32>
    %5 = vector.multi_reduction <add>, %4, %cst [1] : vector<8x32xf32> to vector<8xf32>
    %6 = vector.shape_cast %5 : vector<8xf32> to vector<8x1xf32>
    %cst_2 = arith.constant 3.200000e+01 : f32
    %7 = vector.broadcast %cst_2 : f32 to vector<8x1xf32>
    %8 = arith.divf %6, %7 : vector<8x1xf32>
    %9 = vector.broadcast %8 : vector<8x1xf32> to vector<8x32xf32>
    %10 = arith.subf %4, %9 : vector<8x32xf32>
    %11 = arith.mulf %10, %10 : vector<8x32xf32>
    %cst_3 = arith.constant dense<0.000000e+00> : vector<8xf32>
    %12 = vector.multi_reduction <add>, %11, %cst_3 [1] : vector<8x32xf32> to vector<8xf32>
    %13 = vector.shape_cast %12 : vector<8xf32> to vector<8x1xf32>
    %cst_4 = arith.constant 3.200000e+01 : f32
    %14 = vector.broadcast %cst_4 : f32 to vector<8x1xf32>
    %15 = arith.divf %13, %14 : vector<8x1xf32>
    %cst_5 = arith.constant 9.99999974E-6 : f32
    %16 = vector.broadcast %cst_5 : f32 to vector<8x1xf32>
    %17 = arith.addf %15, %16 : vector<8x1xf32>
    %18 = math.rsqrt %17 : vector<8x1xf32>
    %19 = vector.broadcast %8 : vector<8x1xf32> to vector<8x32xf32>
    %20 = arith.subf %4, %19 : vector<8x32xf32>
    %21 = vector.broadcast %18 : vector<8x1xf32> to vector<8x32xf32>
    %22 = arith.mulf %20, %21 : vector<8x32xf32>
    %c0_6 = arith.constant 0 : index
    %c0_7 = arith.constant 0 : index
    %23 = vector.load %arg5[%c0_6, %c0_7] : memref<1x32xf32, #tpu.memory_space<vmem>>, vector<1x32xf32>
    %24 = vector.broadcast %23 : vector<1x32xf32> to vector<8x32xf32>
    %25 = arith.mulf %22, %24 : vector<8x32xf32>
    %c0_8 = arith.constant 0 : index
    %c0_9 = arith.constant 0 : index
    %26 = vector.load %arg6[%c0_8, %c0_9] : memref<1x32xf32, #tpu.memory_space<vmem>>, vector<1x32xf32>
    %27 = vector.broadcast %26 : vector<1x32xf32> to vector<8x32xf32>
    %28 = arith.addf %25, %27 : vector<8x32xf32>
    %29 = arith.truncf %28 : vector<8x32xf32> to vector<8x32xbf16>
    %c0_10 = arith.constant 0 : index
    %c0_11 = arith.constant 0 : index
    %30 = vector.load %arg8[%c0_10, %c0_11] : memref<8x128xf32, #tpu.memory_space<vmem>>, vector<8x128xf32>
    %c0_12 = arith.constant 0 : index
    %c0_13 = arith.constant 0 : index
    %31 = vector.load %arg4[%c0_12, %c0_13] : memref<32x128xbf16, #tpu.memory_space<vmem>>, vector<32x128xbf16>
    %cst_14 = arith.constant dense<0.000000e+00> : vector<8x128xf32>
    %32 = tpu.matmul %29, %31, %cst_14 {dimension_numbers = #tpu.dot_dimension_numbers<[1], [0], [0], [1], [0, 0, 1, 1], [], []>} : vector<8x32xbf16>, vector<32x128xbf16>, vector<8x128xf32> -> vector<8x128xf32>
    %33 = arith.addf %30, %32 : vector<8x128xf32>
    %c0_15 = arith.constant 0 : index
    %c0_16 = arith.constant 0 : index
    %34 = vector.load %arg8[%c0_15, %c0_16] : memref<8x128xf32, #tpu.memory_space<vmem>>, vector<8x128xf32>
    tpu.vector_store %arg8[%c0_15, %c0_16], %33 {strides = array<i32>} : memref<8x128xf32, #tpu.memory_space<vmem>>, vector<8x128xf32>,
    %c0_i32_17 = arith.constant 0 : i32
    %35 = arith.cmpi eq, %arg2, %c0_i32_17 : i32
    %36 = arith.extui %35 : i1 to i32
    %c0_i32_18 = arith.constant 0 : i32
    %37 = arith.cmpi ne, %36, %c0_i32_18 : i32
    scf.if %37 {
      %c0_19 = arith.constant 0 : index
      %c0_20 = arith.constant 0 : index
      %38 = vector.load %arg8[%c0_19, %c0_20] : memref<8x128xf32, #tpu.memory_space<vmem>>, vector<8x128xf32>
      %c0_21 = arith.constant 0 : index
      %c0_22 = arith.constant 0 : index
      %39 = vector.load %arg7[%c0_21, %c0_22] : memref<8x128xf32, #tpu.memory_space<vmem>>, vector<8x128xf32>
      tpu.vector_store %arg7[%c0_21, %c0_22], %38 {strides = array<i32>} : memref<8x128xf32, #tpu.memory_space<vmem>>, vector<8x128xf32>,
    } else {
    }
    return
  }
  func.func @transform_0(%arg0: i32, %arg1: i32, %arg2: i32) -> (i32, i32) {
    %c0_i32 = arith.constant 0 : i32
    return %arg0, %arg2 : i32, i32
  }
  func.func @transform_1(%arg0: i32, %arg1: i32, %arg2: i32) -> (i32, i32) {
    %c0_i32 = arith.constant 0 : i32
    return %arg2, %arg1 : i32, i32
  }
  func.func @transform_2(%arg0: i32, %arg1: i32, %arg2: i32) -> (i32, i32) {
    %c0_i32 = arith.constant 0 : i32
    %c0_i32_0 = arith.constant 0 : i32
    %c0_i32_1 = arith.constant 0 : i32
    return %c0_i32, %c0_i32_0 : i32, i32
  }
  func.func @transform_3(%arg0: i32, %arg1: i32, %arg2: i32) -> (i32, i32) {
    %c0_i32 = arith.constant 0 : i32
    %c0_i32_0 = arith.constant 0 : i32
    %c0_i32_1 = arith.constant 0 : i32
    return %c0_i32, %c0_i32_0 : i32, i32
  }
  func.func @transform_4(%arg0: i32, %arg1: i32, %arg2: i32) -> (i32, i32) {
    %c0_i32 = arith.constant 0 : i32
    return %arg0, %arg1 : i32, i32
  }
}

</mosaic_0001>

<bundles_post_ra>
// kernel: _lambda_.14
= control target key start
LH: loop header
LB: loop body
LE: loop exit
PB: predicated region body
PF: predicated region fallthrough
CT: control target
= control target key end

     0   :  { %vm19_vm0 = vcmask 261120   ;;  %vm131_vm1 = vcmask 257024   ;;  %s234_s0 = inlined_call_operand.vmem [shape: f32[40,32], index: 0, kind: input, shape index: {}]   ;;  %s235_s1 = inlined_call_operand.vmem [shape: f32[1,32], index: 1, kind: input, shape index: {}]   ;;  %s236_s2 = inlined_call_operand.vmem [shape: f32[1,32], index: 2, kind: input, shape index: {}]   ;;  %s237_s3 = inlined_call_operand.vmem [shape: bf16[40,32], index: 3, kind: output, shape index: {}]  }
   0x1   :  { %v14_v0 = vld [vmem:[%s234_s0] sm:$0xff]  ;;  %v16_v1 = vld [vmem:[%s234_s0 + $0x10] sm:$0xff]  ;;  %v15_v2 = vld [vmem:[%s234_s0 + $0x8] sm:$0xff] }
   0x2   :  { %v20_v3 = vsel %vm19_vm0, %v14_v0, 0.0  ;;  %v26_v4 = vsel %vm19_vm0, %v16_v1, 0.0  ;;  %v17_v5 = vld [vmem:[%s234_s0 + $0x18] sm:$0xff]  ;;  %v23_v6 = vsel %vm19_vm0, %v15_v2, 0.0  ;;  %v18_v8 = vld [vmem:[%s234_s0 + $0x20] sm:$0xff] }
   0x3   :  { %21 = vadd.xlane.f32.xlu0 %v20_v3  ;;  %27 = vadd.xlane.f32.xlu1 %v26_v4  ;;  %v29_v7 = vsel %vm19_vm0, %v17_v5, 0.0  ;;  %v32_v9 = vsel %vm19_vm0, %v18_v8, 0.0  ;;  %v141_v51 = vld [vmem:[%s235_s1] ss:$0 sm:$0xff] }
   0x4   :  { %v142_v53 = vld [vmem:[%s236_s2] ss:$0 sm:$0xff] }
   0x7   :  { %24 = vadd.xlane.f32.xlu0 %v23_v6  ;;  %30 = vadd.xlane.f32.xlu1 %v29_v7 }
   0xb   :  { %33 = vadd.xlane.f32.xlu0 %v32_v9 }
  0x90   :  { %v22_v10 = vpop.xlane.xlu0 %21  ;;  %v28_v11 = vpop.xlane.xlu1 %27 }
  0x91   :  { %v36_v12 = vmul.f32 0.03125, %v22_v10  ;;  %v38_v13 = vmul.f32 0.03125, %v28_v11 }
  0x93   :  { %v41_v14 = vsub.f32 %v14_v0, %v36_v12  ;;  %v43_v15 = vsub.f32 %v16_v1, %v38_v13 }
  0x94   :  { %v25_v16 = vpop.xlane.xlu0 %24  ;;  %v31_v17 = vpop.xlane.xlu1 %30 }
  0x95   :  { %v37_v18 = vmul.f32 0.03125, %v25_v16  ;;  %v39_v19 = vmul.f32 0.03125, %v31_v17  ;;  %v46_v20 = vmul.f32 %v41_v14, %v41_v14  ;;  %v48_v21 = vmul.f32 %v43_v15, %v43_v15 }
  0x97   :  { %v42_v22 = vsub.f32 %v15_v2, %v37_v18  ;;  %v44_v23 = vsub.f32 %v17_v5, %v39_v19  ;;  %v51_v24 = vsel %vm19_vm0, %v46_v20, 0.0  ;;  %v57_v27 = vsel %vm19_vm0, %v48_v21, 0.0 }
  0x98   :  { %52 = vadd.xlane.f32.xlu1 %v51_v24  ;;  %v34_v25 = vpop.xlane.xlu0 %33 }
  0x99   :  { %v40_v26 = vmul.f32 0.03125, %v34_v25  ;;  %v47_v28 = vmul.f32 %v42_v22, %v42_v22  ;;  %v49_v29 = vmul.f32 %v44_v23, %v44_v23 }
  0x9b   :  { %v45_v30 = vsub.f32 %v18_v8, %v40_v26  ;;  %v54_v31 = vsel %vm19_vm0, %v47_v28, 0.0  ;;  %v60_v32 = vsel %vm19_vm0, %v49_v29, 0.0 }
  0x9c   :  { %58 = vadd.xlane.f32.xlu1 %v57_v27  ;;  %55 = vadd.xlane.f32.xlu0 %v54_v31 }
  0x9d   :  { %v50_v33 = vmul.f32 %v45_v30, %v45_v30 }
  0x9f   :  { %v63_v34 = vsel %vm19_vm0, %v50_v33, 0.0 }
  0xa0   :  { %61 = vadd.xlane.f32.xlu0 %v60_v32  ;;  %64 = vadd.xlane.f32.xlu1 %v63_v34 }
 0x125   :  { %v53_v35 = vpop.xlane.xlu1 %52 }
 0x126   :  { %v66_v36 = vmul.f32 0.03125, %v53_v35 }
 0x128   :  { %v71_v37 = vadd.f32 1e-05, %v66_v36 }
 0x129   :  { %v59_v38 = vpop.xlane.xlu1 %58  ;;  %v56_v39 = vpop.xlane.xlu0 %55 }
 0x12a   :  { %153 = vrsqrt.f32 %v71_v37  ;;  %v68_v40 = vmul.f32 0.03125, %v59_v38  ;;  %v67_v41 = vmul.f32 0.03125, %v56_v39 }
 0x12c   :  { %v73_v42 = vadd.f32 1e-05, %v68_v40  ;;  %v72_v43 = vadd.f32 1e-05, %v67_v41 }
 0x12d   :  { %v65_v44 = vpop.xlane.xlu1 %64  ;;  %v62_v45 = vpop.xlane.xlu0 %61 }
 0x12e   :  { %155 = vrsqrt.f32 %v73_v42  ;;  %v70_v46 = vmul.f32 0.03125, %v65_v44  ;;  %v69_v47 = vmul.f32 0.03125, %v62_v45 }
 0x12f   :  { %157 = vrsqrt.f32 %v72_v43 }
 0x130   :  { %v75_v48 = vadd.f32 1e-05, %v70_v46  ;;  %v74_v49 = vadd.f32 1e-05, %v69_v47 }
 0x132   :  { %159 = vrsqrt.f32 %v75_v48 }
 0x133   :  { %161 = vrsqrt.f32 %v74_v49 }
 0x134   :  { %v154_v50 = vpop.eup %153 }
 0x135   :  { %v81_v52 = vmul.f32 %v154_v50, %v41_v14 }
 0x137   :  { %v93_v54 = vmul.f32 %v141_v51, %v81_v52 }
 0x138   :  { %v156_v55 = vpop.eup %155 }
 0x139   :  { %v158_v56 = vpop.eup %157  ;;  %v105_v57 = vadd.f32 %v142_v53, %v93_v54  ;;  %v83_v58 = vmul.f32 %v156_v55, %v43_v15 }
 0x13a   :  { %v82_v59 = vmul.f32 %v158_v56, %v42_v22 }
 0x13b   :  { %v148_v60 = vpack.c.bf16 %v105_v57, %v105_v57  ;;  %v95_v61 = vmul.f32 %v141_v51, %v83_v58 }
 0x13c   :  { %v160_v62 = vpop.eup %159  ;;  %v94_v63 = vmul.f32 %v141_v51, %v82_v59 }
 0x13d   :  { %v162_v0 = vpop.eup %161  ;;  %132 = vst.msk [vmem:[%s237_s3] sm:$0xf] %vm131_vm1, %v148_v60  ;;  %v107_v1 = vadd.f32 %v142_v53, %v95_v61  ;;  %v85_v2 = vmul.f32 %v160_v62, %v45_v30 }
 0x13e   :  { %v106_v3 = vadd.f32 %v142_v53, %v94_v63  ;;  %v84_v4 = vmul.f32 %v162_v0, %v44_v23 }
 0x13f   :  { %v150_v5 = vpack.c.bf16 %v107_v1, %v107_v1  ;;  %v97_v6 = vmul.f32 %v141_v51, %v85_v2 }
 0x140   :  { %v149_v7 = vpack.c.bf16 %v106_v3, %v106_v3  ;;  %v96_v8 = vmul.f32 %v141_v51, %v84_v4 }
 0x141   :  { %134 = vst.msk [vmem:[%s237_s3 + $0x8] sm:$0xf] %vm131_vm1, %v150_v5  ;;  %v109_v9 = vadd.f32 %v142_v53, %v97_v6 }
 0x142   :  { %133 = vst.msk [vmem:[%s237_s3 + $0x4] sm:$0xf] %vm131_vm1, %v149_v7  ;;  %v108_v10 = vadd.f32 %v142_v53, %v96_v8 }
 0x143   :  { %v152_v11 = vpack.c.bf16 %v109_v9, %v109_v9 }
 0x144   :  { %v151_v12 = vpack.c.bf16 %v108_v10, %v108_v10 }
 0x145   :  { %136 = vst.msk [vmem:[%s237_s3 + $0x10] sm:$0xf] %vm131_vm1, %v152_v11 }
 0x146   :  { %135 = vst.msk [vmem:[%s237_s3 + $0xc] sm:$0xf] %vm131_vm1, %v151_v12 }

// kernel: _lambda_.13
= control target key start
LH: loop header
LB: loop body
LE: loop exit
PB: predicated region body
PF: predicated region fallthrough
CT: control target
= control target key end

     0   :  { %v317_v0 = vmov 0   ;;  %vm142_vm0 = vcmask 523264   ;;  %s411_s1 = inlined_call_operand.vmem [shape: bf16[192,128], index: 1, kind: input, shape index: {}]   ;;  %s412_s0 = inlined_call_operand.vmem [shape: bf16[32,192], index: 0, kind: input, shape index: {}]   ;;  %s413_s2 = inlined_call_operand.vmem [shape: bf16[32,128], index: 2, kind: output, shape index: {}]  }
   0x1   :  { %149 = vmatprep.subr.bf16.mxu0 %v317_v0  ;;  %274 = vmatprep.subr.bf16.mxu1 %v317_v0  ;;  %v299_v1 = vld [vmem:[%s411_s1] sm:$0xff]   ;;  %v300_v2 = vld [vmem:[%s411_s1 + $0x8] sm:$0xff]   ;;  %v301_v3 = vld [vmem:[%s411_s1 + $0x10] sm:$0xff]  }
   0x2   :  { %150 = vmatpush1.bf16.msra.mxu0 %v299_v1  ;;  %286 = vmatpush1.bf16.msra.mxu1 %v299_v1  ;;  %v302_v4 = vld [vmem:[%s411_s1 + $0x18] sm:$0xff]   ;;  %v313_v5 = vld [vmem:[%s412_s0 + $0x4] ss:$8 sps:$4 sm:$0xff]   ;;  %v305_v9 = vld [vmem:[%s411_s1 + $0x30] sm:$0xff]  }
   0x3   :  { %151 = vmatprep.subr.bf16.mxu0 %v317_v0  ;;  %275 = vmatprep.subr.bf16.mxu1 %v317_v0  ;;  %v303_v6 = vld [vmem:[%s411_s1 + $0x20] sm:$0xff]   ;;  %v316_v7 = vld [vmem:[%s412_s0 + $0x14] ss:$8 sps:$4 sm:$0xff]   ;;  %v304_v8 = vld [vmem:[%s411_s1 + $0x28] sm:$0xff]  }
   0x4   :  { %253 = vmatprep.mubr.msk.bf16.mxu0 %vm142_vm0, %v313_v5  ;;  %254 = vmatprep.mubr.msk.bf16.mxu1 %vm142_vm0, %v316_v7  ;;  %v306_v10 = vld [vmem:[%s411_s1 + $0x38] sm:$0xff]   ;;  %v307_v11 = vld [vmem:[%s411_s1 + $0x40] sm:$0xff]   ;;  %v308_v12 = vld [vmem:[%s411_s1 + $0x48] sm:$0xff]  }
   0x5   :  { %v309_v13 = vld [vmem:[%s411_s1 + $0x50] sm:$0xff]   ;;  %v310_v14 = vld [vmem:[%s411_s1 + $0x58] sm:$0xff]   ;;  %v311_v15 = vld [vmem:[%s412_s0] ss:$8 sps:$4 sm:$0xff]  }
   0x6   :  { %152 = vmatpush1.bf16.msra.mxu0 %v300_v2  ;;  %287 = vmatpush1.bf16.msra.mxu1 %v300_v2  ;;  %v314_v16 = vld [vmem:[%s412_s0 + $0x10] ss:$8 sps:$4 sm:$0xff]  }
   0x7   :  { %153 = vmatprep.subr.bf16.mxu0 %v317_v0  ;;  %276 = vmatprep.subr.bf16.mxu1 %v317_v0 }
   0xa   :  { %154 = vmatpush1.bf16.msra.mxu0 %v301_v3  ;;  %288 = vmatpush1.bf16.msra.mxu1 %v301_v3 }
   0xb   :  { %155 = vmatprep.subr.bf16.mxu0 %v317_v0  ;;  %277 = vmatprep.subr.bf16.mxu1 %v317_v0 }
   0xe   :  { %156 = vmatpush1.bf16.msra.mxu0 %v302_v4  ;;  %289 = vmatpush1.bf16.msra.mxu1 %v302_v4 }
   0xf   :  { %157 = vmatprep.subr.bf16.mxu0 %v317_v0  ;;  %278 = vmatprep.subr.bf16.mxu1 %v317_v0 }
  0x12   :  { %158 = vmatpush1.bf16.msra.mxu0 %v303_v6  ;;  %290 = vmatpush1.bf16.msra.mxu1 %v303_v6 }
  0x13   :  { %159 = vmatprep.subr.bf16.mxu0 %v317_v0  ;;  %279 = vmatprep.subr.bf16.mxu1 %v317_v0 }
  0x16   :  { %160 = vmatpush1.bf16.msra.mxu0 %v304_v8  ;;  %291 = vmatpush1.bf16.msra.mxu1 %v304_v8 }
  0x17   :  { %161 = vmatprep.subr.bf16.mxu0 %v317_v0  ;;  %280 = vmatprep.subr.bf16.mxu1 %v317_v0 }
  0x1a   :  { %162 = vmatpush1.bf16.msra.mxu0 %v305_v9  ;;  %292 = vmatpush1.bf16.msra.mxu1 %v305_v9 }
  0x1b   :  { %163 = vmatprep.subr.bf16.mxu0 %v317_v0  ;;  %281 = vmatprep.subr.bf16.mxu1 %v317_v0 }
  0x1e   :  { %164 = vmatpush1.bf16.msra.mxu0 %v306_v10  ;;  %293 = vmatpush1.bf16.msra.mxu1 %v306_v10 }
  0x1f   :  { %165 = vmatprep.subr.bf16.mxu0 %v317_v0  ;;  %282 = vmatprep.subr.bf16.mxu1 %v317_v0 }
  0x22   :  { %166 = vmatpush1.bf16.msra.mxu0 %v307_v11  ;;  %294 = vmatpush1.bf16.msra.mxu1 %v307_v11 }
  0x23   :  { %167 = vmatprep.subr.bf16.mxu0 %v317_v0  ;;  %283 = vmatprep.subr.bf16.mxu1 %v317_v0 }
  0x26   :  { %168 = vmatpush1.bf16.msra.mxu0 %v308_v12  ;;  %295 = vmatpush1.bf16.msra.mxu1 %v308_v12 }
  0x27   :  { %169 = vmatprep.subr.bf16.mxu0 %v317_v0  ;;  %284 = vmatprep.subr.bf16.mxu1 %v317_v0 }
  0x2a   :  { %170 = vmatpush1.bf16.msra.mxu0 %v309_v13  ;;  %296 = vmatpush1.bf16.msra.mxu1 %v309_v13 }
  0x2b   :  { %171 = vmatprep.subr.bf16.mxu0 %v317_v0  ;;  %285 = vmatprep.subr.bf16.mxu1 %v317_v0 }
  0x2e   :  { %172 = vmatpush1.bf16.msra.mxu0 %v310_v14  ;;  %297 = vmatpush1.bf16.msra.mxu1 %v310_v14 }
  0x31   :  { %182 = vmatmul.mubr.bf16.vlgmr.msra.gmra.mrb[0].mxu0 %v311_v15  ;;  %190 = vmatmul.mubr.bf16.vlgmr.msra.gmra.mrb[0].mxu1 %v314_v16 }
 0x104   :  { %v183_v17 = vpop.f32.mrb[0].mxu0  ;;  %v191_v18 = vpop.f32.mrb[0].mxu1 }
 0x105   :  { %v185_v19 = vpop.f32.mrb[1].mxu0  ;;  %v193_v20 = vpop.f32.mrb[1].mxu1 }
 0x106   :  { %v186_v21 = vpop.f32.mrb[2].mxu0  ;;  %v194_v22 = vpop.f32.mrb[2].mxu1 }
 0x107   :  { %v266_v23 = vpack.c.bf16 %v186_v21, %v183_v17  ;;  %v271_v24 = vpack.c.bf16 %v194_v22, %v191_v18  ;;  %v188_v25 = vpop.f32.mrb[3].mxu0  ;;  %v196_v26 = vpop.f32.mrb[3].mxu1 }
 0x109   :  { %267 = vst [vmem:[%s413_s2] sm:$0xff] %v266_v23   ;;  %273 = vst [vmem:[%s413_s2 + $0x8] sm:$0xff] %v271_v24  }

// kernel: _lambda_.15
= control target key start
LH: loop header
LB: loop body
LE: loop exit
PB: predicated region body
PF: predicated region fallthrough
CT: control target
= control target key end

     0   :  { %vm40_vm0 = vcmask 261120   ;;  %v357_v39 = vmov 0.0   ;;  %vm358_vm1 = vmmov 0   ;;  %s453_s0 = inlined_call_operand.vmem [shape: bf16[40,32], index: 0, kind: input, shape index: {}]   ;;  %s454_s1 = inlined_call_operand.vmem [shape: bf16[32,128], index: 1, kind: input, shape index: {}]   ;;  %s455_s2 = inlined_call_operand.vmem [shape: f32[1,32], index: 2, kind: input, shape index: {}]   ;;  %s456_s3 = inlined_call_operand.vmem [shape: f32[1,32], index: 3, kind: input, shape index: {}]   ;;  %s457_s4 = inlined_call_operand.vmem [shape: f32[1,128], index: 4, kind: input, shape index: {}]   ;;  %s458_s5 = inlined_call_operand.vmem [shape: bf16[40,128], index: 5, kind: output, shape index: {}]  }
   0x1   :  { %v316_v0 = vld [vmem:[%s453_s0 + $0x8] sm:$0xff]   ;;  %v299_v1 = vld [vmem:[%s453_s0] sm:$0xff]   ;;  %v34_v5 = vld [vmem:[%s453_s0 + $0x10] sm:$0xf]  ;;  %339 = vmatprep.subr.bf16.mxu1 %v357_v39  ;;  %323 = vmatprep.subr.bf16.mxu0 %v357_v39 }
   0x2   :  { %v304_v2 = vunpack.c.l.bf16 %v316_v0  ;;  %v305_v3 = vunpack.c.h.bf16 %v316_v0  ;;  %v300_v4 = vunpack.c.l.bf16 %v299_v1  ;;  %v301_v6 = vunpack.c.h.bf16 %v299_v1  ;;  %v345_v38 = vld [vmem:[%s454_s1] sm:$0xff]   ;;  %v346_v40 = vld [vmem:[%s454_s1 + $0x8] sm:$0xff]   ;;  %331 = vmatprep.mubr.msk.bf16.mxu1 %vm358_vm1, %v357_v39  ;;  %327 = vmatprep.mubr.msk.bf16.mxu0 %vm358_vm1, %v357_v39 }
   0x3   :  { %v39_v10 = vunpack.c.l.bf16 %v34_v5  ;;  %341 = vmatpush3.bf16.msra.mxu1 %v345_v38  ;;  %324 = vmatpush3.bf16.msra.mxu0 %v345_v38  ;;  %v280_v58 = vld [vmem:[%s455_s2] ss:$0 sm:$0xff] }
   0x4   :  { %v47_v7 = vsel %vm40_vm0, %v304_v2, 0.0  ;;  %v41_v8 = vsel %vm40_vm0, %v300_v4, 0.0  ;;  %v50_v9 = vsel %vm40_vm0, %v305_v3, 0.0  ;;  %v44_v11 = vsel %vm40_vm0, %v301_v6, 0.0  ;;  %340 = vmatprep.subr.bf16.mxu1 %v357_v39  ;;  %325 = vmatprep.subr.bf16.mxu0 %v357_v39  ;;  %v281_v0 = vld [vmem:[%s456_s3] ss:$0 sm:$0xff] }
   0x5   :  { %48 = vadd.xlane.f32.xlu0 %v47_v7  ;;  %42 = vadd.xlane.f32.xlu1 %v41_v8  ;;  %v53_v12 = vsel %vm40_vm0, %v39_v10, 0.0 }
   0x7   :  { %342 = vmatpush3.bf16.msra.mxu1 %v346_v40  ;;  %326 = vmatpush3.bf16.msra.mxu0 %v346_v40 }
   0x9   :  { %51 = vadd.xlane.f32.xlu0 %v50_v9  ;;  %45 = vadd.xlane.f32.xlu1 %v44_v11 }
   0xd   :  { %54 = vadd.xlane.f32.xlu0 %v53_v12 }
  0x92   :  { %v49_v13 = vpop.xlane.xlu0 %48  ;;  %v43_v14 = vpop.xlane.xlu1 %42 }
  0x93   :  { %v59_v15 = vmul.f32 0.03125, %v49_v13  ;;  %v57_v16 = vmul.f32 0.03125, %v43_v14 }
  0x95   :  { %v403_v17 = vsub.f32 %v304_v2, %v59_v15  ;;  %v405_v18 = vsub.f32 %v300_v4, %v57_v16 }
  0x96   :  { %v52_v19 = vpop.xlane.xlu0 %51  ;;  %v46_v20 = vpop.xlane.xlu1 %45 }
  0x97   :  { %v60_v21 = vmul.f32 0.03125, %v52_v19  ;;  %v69_v22 = vmul.f32 %v403_v17, %v403_v17  ;;  %v58_v23 = vmul.f32 0.03125, %v46_v20  ;;  %v67_v24 = vmul.f32 %v405_v18, %v405_v18 }
  0x99   :  { %v65_v25 = vsub.f32 %v305_v3, %v60_v21  ;;  %v78_v26 = vsel %vm40_vm0, %v69_v22, 0.0  ;;  %v412_v27 = vsub.f32 %v301_v6, %v58_v23  ;;  %v72_v31 = vsel %vm40_vm0, %v67_v24, 0.0 }
  0x9a   :  { %v55_v28 = vpop.xlane.xlu0 %54  ;;  %79 = vadd.xlane.f32.xlu1 %v78_v26 }
  0x9b   :  { %v61_v29 = vmul.f32 0.03125, %v55_v28  ;;  %v70_v30 = vmul.f32 %v65_v25, %v65_v25  ;;  %v68_v32 = vmul.f32 %v412_v27, %v412_v27 }
  0x9d   :  { %v66_v33 = vsub.f32 %v39_v10, %v61_v29  ;;  %v81_v34 = vsel %vm40_vm0, %v70_v30, 0.0  ;;  %v75_v36 = vsel %vm40_vm0, %v68_v32, 0.0 }
  0x9e   :  { %82 = vadd.xlane.f32.xlu0 %v81_v34  ;;  %73 = vadd.xlane.f32.xlu1 %v72_v31 }
  0x9f   :  { %v71_v35 = vmul.f32 %v66_v33, %v66_v33 }
  0xa1   :  { %v84_v37 = vsel %vm40_vm0, %v71_v35, 0.0 }
  0xa2   :  { %85 = vadd.xlane.f32.xlu1 %v84_v37  ;;  %76 = vadd.xlane.f32.xlu0 %v75_v36 }
 0x127   :  { %v80_v41 = vpop.xlane.xlu1 %79 }
 0x128   :  { %v89_v42 = vmul.f32 0.03125, %v80_v41 }
 0x12a   :  { %v94_v43 = vadd.f32 1e-05, %v89_v42 }
 0x12b   :  { %v83_v44 = vpop.xlane.xlu0 %82  ;;  %v74_v45 = vpop.xlane.xlu1 %73 }
 0x12c   :  { %347 = vrsqrt.f32 %v94_v43  ;;  %v90_v46 = vmul.f32 0.03125, %v83_v44  ;;  %v87_v47 = vmul.f32 0.03125, %v74_v45 }
 0x12e   :  { %v95_v48 = vadd.f32 1e-05, %v90_v46  ;;  %v92_v49 = vadd.f32 1e-05, %v87_v47 }
 0x12f   :  { %v77_v50 = vpop.xlane.xlu0 %76  ;;  %v86_v51 = vpop.xlane.xlu1 %85 }
 0x130   :  { %349 = vrsqrt.f32 %v95_v48  ;;  %v88_v52 = vmul.f32 0.03125, %v77_v50  ;;  %v91_v53 = vmul.f32 0.03125, %v86_v51 }
 0x131   :  { %351 = vrsqrt.f32 %v92_v49 }
 0x132   :  { %v93_v54 = vadd.f32 1e-05, %v88_v52  ;;  %v96_v55 = vadd.f32 1e-05, %v91_v53 }
 0x134   :  { %353 = vrsqrt.f32 %v93_v54 }
 0x135   :  { %355 = vrsqrt.f32 %v96_v55 }
 0x136   :  { %v348_v56 = vpop.eup %347 }
 0x137   :  { %v104_v57 = vmul.f32 %v348_v56, %v403_v17 }
 0x139   :  { %v116_v62 = vmul.f32 %v280_v58, %v104_v57 }
 0x13a   :  { %v350_v59 = vpop.eup %349 }
 0x13b   :  { %v352_v60 = vpop.eup %351  ;;  %v105_v61 = vmul.f32 %v350_v59, %v65_v25  ;;  %v128_v5 = vadd.f32 %v281_v0, %v116_v62 }
 0x13c   :  { %v102_v63 = vmul.f32 %v352_v60, %v405_v18  ;;  %v287_v18 = vld [vmem:[%s457_s4] ss:$0 sm:$0xff] }
 0x13d   :  { %v117_v1 = vmul.f32 %v280_v58, %v105_v61 }
 0x13e   :  { %v354_v2 = vpop.eup %353  ;;  %v114_v7 = vmul.f32 %v280_v58, %v102_v63 }
 0x13f   :  { %v356_v3 = vpop.eup %355  ;;  %v103_v4 = vmul.f32 %v354_v2, %v412_v27  ;;  %v129_v6 = vadd.f32 %v281_v0, %v117_v1 }
 0x140   :  { %v106_v8 = vmul.f32 %v356_v3, %v66_v33  ;;  %v126_v12 = vadd.f32 %v281_v0, %v114_v7 }
 0x141   :  { %v132_v9 = vpack.c.bf16 %v129_v6, %v128_v5  ;;  %v115_v10 = vmul.f32 %v280_v58, %v103_v4 }
 0x142   :  { %v118_v11 = vmul.f32 %v280_v58, %v106_v8 }
 0x143   :  { %332 = vmatmul.mubr.msk.bf16.vlgmr.msra.gmra.mrb[0].mxu1 %vm40_vm0, %v132_v9  ;;  %v127_v13 = vadd.f32 %v281_v0, %v115_v10 }
 0x144   :  { %335 = vmatprep.mubr.msk.bf16.mxu1 %vm358_vm1, %v357_v39  ;;  %v130_v15 = vadd.f32 %v281_v0, %v118_v11 }
 0x145   :  { %v131_v14 = vpack.c.bf16 %v127_v13, %v126_v12 }
 0x146   :  { %v133_v16 = vpack.c.bf16 %v130_v15, %v130_v15 }
 0x147   :  { %328 = vmatmul.mubr.msk.bf16.vlgmr.msra.gmra.mrb[0].mxu0 %vm40_vm0, %v131_v14 }
 0x14b   :  { %336 = vmatmul.mubr.msk.bf16.gmra.mrb[4].mxu1 %vm40_vm0, %v133_v16 }
 0x216   :  { %v206_v17 = vpop.f32.mrb[0].mxu1 }
 0x217   :  { %v333_v19 = vpop.f32.mrb[1].mxu1  ;;  %v247_v21 = vadd.f32 %v287_v18, %v206_v17 }
 0x218   :  { %v209_v20 = vpop.f32.mrb[2].mxu1 }
 0x219   :  { %v248_v22 = vadd.f32 %v287_v18, %v209_v20  ;;  %v334_v23 = vpop.f32.mrb[3].mxu1 }
 0x21a   :  { %v198_v24 = vpop.f32.mrb[0].mxu0 }
 0x21b   :  { %v314_v25 = vpack.c.bf16 %v248_v22, %v247_v21  ;;  %v329_v26 = vpop.f32.mrb[1].mxu0  ;;  %v245_v28 = vadd.f32 %v287_v18, %v198_v24 }
 0x21c   :  { %v201_v27 = vpop.f32.mrb[2].mxu0 }
 0x21d   :  { %317 = vst [vmem:[%s458_s5 + $0x8] sm:$0xff] %v314_v25   ;;  %v246_v29 = vadd.f32 %v287_v18, %v201_v27  ;;  %v330_v30 = vpop.f32.mrb[3].mxu0 }
 0x21e   :  { %v214_v31 = vpop.f32.mrb[4].mxu1 }
 0x21f   :  { %v309_v32 = vpack.c.bf16 %v246_v29, %v245_v28  ;;  %v249_v33 = vadd.f32 %v287_v18, %v214_v31  ;;  %v337_v34 = vpop.f32.mrb[5].mxu1 }
 0x220   :  { %v217_v35 = vpop.f32.mrb[6].mxu1 }
 0x221   :  { %310 = vst [vmem:[%s458_s5] sm:$0xff] %v309_v32   ;;  %v297_v36 = vpack.c.bf16 %v249_v33, %v249_v33  ;;  %v338_v37 = vpop.f32.mrb[7].mxu1 }
 0x223   :  { %275 = vst [vmem:[%s458_s5 + $0x10] sm:$0xf] %v297_v36 }

// kernel: _lambda_.16
= control target key start
LH: loop header
LB: loop body
LE: loop exit
PB: predicated region body
PF: predicated region fallthrough
CT: control target
= control target key end

     0   :  { %s1033_s12 = smov 0   ;;  %s1035_s13 = smov 0   ;;  %s1128_s0 = inlined_call_operand.vmem [shape: bf16[2,4,24,8], index: 0, kind: input, shape index: {}]   ;;  %s1129_s1 = inlined_call_operand.vmem [shape: bf16[2,4,24,8], index: 1, kind: input, shape index: {}]   ;;  %s1130_s2 = inlined_call_operand.vmem [shape: bf16[2,4,24,8], index: 2, kind: input, shape index: {}]   ;;  %s1131_s3 = inlined_call_operand.vmem [shape: bf16[2,4,24,8], index: 3, kind: output, shape index: {}]  }
   0x1   :  { %s1037_s14 = smov 0   ;;  %s1039_s15 = smov 0  }
   0x2   :  { %s1041_s16 = smov 0  }
   0x3 LB: > { %s35_s17 = sadd.s32 1, %s1000_s14  ;;  %s39_s18 = sadd.s32 1, %s1004_s15  ;;  %s1008_s16 = sphi %s1041_s16, %s13_s16   ;;  %s1004_s15 = sphi %s1039_s15, %s1135_s15   ;;  %s1000_s14 = sphi %s1037_s14, %s1134_s14   ;;  %s996_s13 = sphi %s1035_s13, %s1133_s13   ;;  %s992_s12 = sphi %s1033_s12, %s1132_s12  }
   0x4   : > { %p37_p0 = scmp.ge.s32.totalorder %s35_s17, 4  ;;  %p849_p1 = scmp.ge.s32.totalorder %s1008_s16, 1 }
   0x5   : > { %p226_p2 = scmp.lt.s32.totalorder %s1008_s16, 9 }
   0x6   : > { %s1137_s17 = smov (%p37_p0, %s35_s17), 0  ;;  %s1139_s18 = smov (!%p37_p0, %s39_s18), %s1004_s15 }
   0x7   : > { %p227_p3 = pnand %p849_p1, %p226_p2  ;;  %p41_p4 = scmp.ge.s32.totalorder %s1139_s18, 2 }
   0x8   : > { %p293_p5 = scmp.lt.s32.totalorder (!%p227_p3), %s996_s13, 1  ;;  %p295_p6 = scmp.lt.s32.totalorder (!%p227_p3), %s992_s12, 3  ;;  %vm360_vm0 = vcmask (!%p227_p3), 64512   ;;  %vm353_vm1 = vcmask (!%p227_p3), 7168   ;;  %v1010_v6 = vmov (!%p227_p3), -inf   ;;  %v454_v7 = vlaneseq (!%p227_p3) }
   0x9   : > { %s1141_s18 = smov (%p41_p4, %s1139_s18), 0  ;;  %230 = sbr.rel (%p227_p3) target bundleno = 850 (0x352), region = 32 }
   0xa   : > { %356 = vst.msk [vmem:[#allocation2 + $0x10] sm:$0xff] (!%p227_p3), %vm353_vm1, %v1010_v6  ;;  %354 = vst.msk [vmem:[#allocation2] sm:$0xff] (!%p227_p3), %vm353_vm1, %v1010_v6  ;;  %v455_v8 = vand.u32 (!%p227_p3), 127, %v454_v7  ;;  %vm465_vm3 = vcmask (!%p227_p3), 195584   ;;  %v1011_v22 = vmov (!%p227_p3), 0   ;;  %v1012_v23 = vmov (!%p227_p3), 0.0  }
   0xb   : > { %355 = vst.msk [vmem:[#allocation2 + $0x8] sm:$0xff] (!%p227_p3), %vm353_vm1, %v1010_v6  ;;  %944 = vset.pattern.permute.xlu1 (!%p227_p3), %v1011_v22  ;;  %945 = vset.pattern.permute.xlu0 (!%p227_p3), %v1011_v22  ;;  %357 = vst.msk [vmem:[#allocation3] sm:$0xff] (!%p227_p3), %vm353_vm1, %v1012_v23  ;;  %vm571_vm4 = vcmask (!%p227_p3), 1043456   ;;  %vm675_vm5 = vcmask (!%p227_p3), 60416  }
   0xc   : > { %vm458_vm2 = vcmp.lt.s32.totalorder (!%p227_p3), %v455_v8, 17  ;;  %361 = vst.msk [vmem:[#allocation4] sm:$0xff] (!%p227_p3), %vm360_vm0, %v1012_v23  ;;  %362 = vst.msk [vmem:[#allocation4 + $0x8] sm:$0xff] (!%p227_p3), %vm360_vm0, %v1012_v23 }
   0xd   : > { %363 = vst.msk [vmem:[#allocation4 + $0x10] sm:$0xff] (!%p227_p3), %vm360_vm0, %v1012_v23 }
   0xe   : > { %358 = vst.msk [vmem:[#allocation3 + $0x8] sm:$0xff] (!%p227_p3), %vm353_vm1, %v1012_v23  ;;  %359 = vst.msk [vmem:[#allocation3 + $0x10] sm:$0xff] (!%p227_p3), %vm353_vm1, %v1012_v23 }
  0x10   : > { %s1143_s13 = smov (!%p293_p5, %s996_s13), 1  ;;  %s1145_s12 = smov (!%p295_p6, %s992_s12), 3 }
  0x11   : > { %s900_s19 = smul.u32 12, %s1143_s13  ;;  %v464_v24 = vld [vmem:[#allocation2 + $0x10] sm:$0xff]  ;;  %v462_v25 = vld [vmem:[#allocation2] sm:$0xff] }
  0x12   : > { %s899_s20 = smul.u32 3, %s1145_s12  ;;  %v463_v31 = vld [vmem:[#allocation2 + $0x8] sm:$0xff]  ;;  %v511_v62 = vld [vmem:[#allocation3] sm:$0xff] }
  0x14   : > { %s302_s21 = sadd.s32 %s900_s19, %s899_s20 }
  0x15   : > { %s1063_s22 = sshll.u32 %s302_s21, 2 }
  0x16   : > { %s318_s25 = scalar_lea.vmem %s1129_s1, %s1063_s22  ;;  %s304_s28 = scalar_lea.vmem %s1128_s0, %s1063_s22 }
  0x17   : > { %v946_v0 = vld [vmem:[%s318_s25] sm:$0xff]   ;;  %v947_v1 = vld [vmem:[%s318_s25 + $0x8] ss:$0 sps:$4 sm:$0xff]   ;;  %s332_s4 = scalar_lea.vmem %s1130_s2, %s1063_s22  ;;  %s346_s7 = scalar_lea.vmem %s1131_s3, %s1063_s22 }
  0x18   : > { %v948_v2 = vld [vmem:[%s304_s28] sm:$0xff]   ;;  %896 = vmatprep.subr.msk.bf16.mxu0 %vm360_vm0, %v946_v0  ;;  %v397_v3 = vsel %vm360_vm0, %v946_v0, 0  ;;  %v400_v4 = vsel %vm360_vm0, %v947_v1, 0  ;;  %v949_v5 = vld [vmem:[%s304_s28 + $0x8] ss:$0 sps:$4 sm:$0xff]  }
  0x19   : > { %881 = vmatpush3.bf16.xpose.msra.mxu0 %v397_v3  ;;  %884 = vmatprep.mubr.msk.bf16.mxu0 %vm360_vm0, %v948_v2  ;;  %v950_v36 = vld [vmem:[%s332_s4] sm:$0xff]   ;;  %v951_v37 = vld [vmem:[%s332_s4 + $0x8] ss:$0 sps:$4 sm:$0xff]  }
  0x1a   : > { %897 = vmatprep.subr.msk.bf16.mxu0 %vm360_vm0, %v947_v1  ;;  %888 = vmatprep.subr.bf16.mxu1 %v950_v36  ;;  %v573_v38 = vsel %vm571_vm4, %v951_v37, 0  ;;  %v513_v1 = vld [vmem:[#allocation3 + $0x10] sm:$0xff]  ;;  %v512_v3 = vld [vmem:[#allocation3 + $0x8] sm:$0xff] }
  0x1b   : > { %889 = vmatpush3.bf16.msra.mxu1 %v950_v36 }
  0x1c   : > { %898 = vmatprep.subr.msk.bf16.mxu1 %vm571_vm4, %v951_v37 }
  0x1f   : > { %891 = vmatpush3.bf16.msra.mxu1 %v573_v38 }
  0x21   : > { %883 = vmatpush3.bf16.xpose.msra.mxu0 %v400_v4 }
  0x28   : > { %885 = vmatmul.mubr.msk.bf16.vlgmr.msra.gmra.mrb[0].mxu0 %vm360_vm0, %v949_v5 }
  0xfb   : > { %v886_v9 = vpop.f32.mrb[0].mxu0 }
  0xfc   : > { %v452_v10 = vmul.f32 0.35355338, %v886_v9  ;;  %v436_v11 = vpop.f32.mrb[1].mxu0 }
  0xfd   : > { %v450_v12 = vmul.f32 0.35355338, %v436_v11  ;;  %v887_v13 = vpop.f32.mrb[2].mxu0 }
  0xfe   : > { %v439_v14 = vpop.f32.mrb[3].mxu0  ;;  %v461_v15 = vsel %vm458_vm2, %v452_v10, -1e+30 }
  0xff   : > { %v451_v16 = vmul.f32 0.35355338, %v439_v14  ;;  %v472_v17 = vsel %vm465_vm3, %v461_v15, -inf  ;;  %v459_v18 = vsel %vm458_vm2, %v450_v12, -1e+30 }
 0x100   : > { %473 = vmax.xlane.f32.xlu1 %v472_v17  ;;  %v466_v19 = vsel %vm465_vm3, %v459_v18, -inf  ;;  %v535_v17 = vld [vmem:[#allocation4 + $0x10] sm:$0xff] }
 0x101   : > { %467 = vmax.xlane.f32.xlu0 %v466_v19  ;;  %v460_v20 = vsel %vm458_vm2, %v451_v16, -1e+30  ;;  %v533_v19 = vld [vmem:[#allocation4] sm:$0xff] }
 0x102   : > { %v469_v21 = vsel %vm465_vm3, %v460_v20, -inf }
 0x105   : > { %470 = vmax.xlane.f32.xlu0 %v469_v21  ;;  %v534_v21 = vld [vmem:[#allocation4 + $0x8] sm:$0xff] }
 0x18d   : > { %v474_v26 = vpop.xlane.xlu1 %473 }
 0x18e   : > { %v477_v27 = vmax.f32 %v464_v24, %v474_v26  ;;  %v468_v28 = vpop.xlane.xlu0 %467 }
 0x18f   : > { %v475_v29 = vmax.f32 %v462_v25, %v468_v28 }
 0x190   : > { %v480_v30 = vsub.f32 %v464_v24, %v477_v27  ;;  %631 = vst.msk [vmem:[#allocation2 + $0x10] sm:$0xff] %vm353_vm1, %v477_v27 }
 0x191   : > { %v478_v32 = vsub.f32 %v462_v25, %v475_v29  ;;  %629 = vst.msk [vmem:[#allocation2] sm:$0xff] %vm353_vm1, %v475_v29  ;;  %489 = vperm.xlu1 %944, %v475_v29  }
 0x192   : > { %v471_v33 = vpop.xlane.xlu0 %470  ;;  %v485_v58 = vmul.f32 1.442695, %v480_v30 }
 0x193   : > { %v476_v34 = vmax.f32 %v463_v31, %v471_v33  ;;  %v481_v56 = vmul.f32 1.442695, %v478_v32 }
 0x195   : > { %v479_v35 = vsub.f32 %v463_v31, %v476_v34  ;;  %630 = vst.msk [vmem:[#allocation2 + $0x8] sm:$0xff] %vm353_vm1, %v476_v34  ;;  %499 = vperm.xlu1 %944, %v477_v27   ;;  %494 = vperm.xlu0 %945, %v476_v34  }
 0x197   : > { %v483_v57 = vmul.f32 1.442695, %v479_v35 }
 0x210   : > { %v490_v39 = vpop.permute.xlu1 %489 }
 0x211   : > { %v502_v40 = vsub.f32 %v459_v18, %v490_v39 }
 0x213   : > { %v505_v41 = vmul.f32 1.442695, %v502_v40 }
 0x214   : > { %v500_v42 = vpop.permute.xlu1 %499  ;;  %v495_v43 = vpop.permute.xlu0 %494 }
 0x215   : > { %952 = vpow2.f32 %v505_v41  ;;  %v504_v44 = vsub.f32 %v461_v15, %v500_v42  ;;  %v503_v45 = vsub.f32 %v460_v20, %v495_v43 }
 0x217   : > { %v509_v46 = vmul.f32 1.442695, %v504_v44  ;;  %v507_v47 = vmul.f32 1.442695, %v503_v45 }
 0x219   : > { %954 = vpow2.f32 %v509_v46 }
 0x21a   : > { %956 = vpow2.f32 %v507_v47 }
 0x21b   : > { %958 = vpow2.f32 %v481_v56 }
 0x21c   : > { %960 = vpow2.f32 %v483_v57 }
 0x21d   : > { %962 = vpow2.f32 %v485_v58 }
 0x21f   : > { %v953_v48 = vpop.eup %952 }
 0x220   : > { %v517_v49 = vsel %vm465_vm3, %v953_v48, 0.0 }
 0x221   : > { %518 = vadd.xlane.f32.xlu1 %v517_v49 }
 0x223   : > { %v955_v50 = vpop.eup %954 }
 0x224   : > { %v957_v51 = vpop.eup %956  ;;  %v523_v52 = vsel %vm465_vm3, %v955_v50, 0.0  ;;  %v555_v53 = vpack.c.bf16 %v955_v50, %v955_v50 }
 0x225   : > { %524 = vadd.xlane.f32.xlu1 %v523_v52  ;;  %v520_v54 = vsel %vm465_vm3, %v957_v51, 0.0  ;;  %v554_v55 = vpack.c.bf16 %v957_v51, %v953_v48  ;;  %v959_v59 = vpop.eup %958 }
 0x226   : > { %521 = vadd.xlane.f32.xlu0 %v520_v54  ;;  %v961_v60 = vpop.eup %960  ;;  %v514_v63 = vmul.f32 %v959_v59, %v511_v62 }
 0x227   : > { %892 = vmatprep.mubr.msk.bf16.mxu1 %vm465_vm3, %v554_v55  ;;  %v963_v61 = vpop.eup %962  ;;  %v515_v6 = vmul.f32 %v961_v60, %v512_v3 }
 0x228   : > { %893 = vmatmul.mubr.msk.bf16.vlgmr.msra.gmra.mrb[0].mxu1 %vm465_vm3, %v555_v53  ;;  %v516_v4 = vmul.f32 %v963_v61, %v513_v1 }
 0x236   : > { %538 = vperm.xlu1 %944, %v959_v59  }
 0x23a   : > { %543 = vperm.xlu1 %944, %v961_v60  }
 0x23c   : > { %548 = vperm.xlu0 %945, %v963_v61  }
 0x2ae   : > { %v519_v0 = vpop.xlane.xlu1 %518 }
 0x2af   : > { %v526_v2 = vadd.f32 %v519_v0, %v514_v63 }
 0x2b1   : > { %530 = vst.msk [vmem:[#allocation3] sm:$0xff] %vm353_vm1, %v526_v2 }
 0x2b2   : > { %v525_v5 = vpop.xlane.xlu1 %524 }
 0x2b3   : > { %v528_v7 = vadd.f32 %v525_v5, %v516_v4  ;;  %v522_v8 = vpop.xlane.xlu0 %521 }
 0x2b4   : > { %v527_v9 = vadd.f32 %v522_v8, %v515_v6 }
 0x2b5   : > { %532 = vst.msk [vmem:[#allocation3 + $0x10] sm:$0xff] %vm353_vm1, %v528_v7 }
 0x2b6   : > { %531 = vst.msk [vmem:[#allocation3 + $0x8] sm:$0xff] %vm353_vm1, %v527_v9  ;;  %v539_v16 = vpop.permute.xlu1 %538 }
 0x2b7   : > { %v551_v23 = vmul.f32 %v539_v16, %v533_v19 }
 0x2b8   : > { %v638_v10 = vld [vmem:[#allocation3] sm:$0xff] }
 0x2b9   : > { %964 = vrcp.f32 %v638_v10 }
 0x2ba   : > { %v544_v22 = vpop.permute.xlu1 %543 }
 0x2bb   : > { %v549_v18 = vpop.permute.xlu0 %548  ;;  %v552_v27 = vmul.f32 %v544_v22, %v534_v21 }
 0x2bc   : > { %v640_v12 = vld [vmem:[#allocation3 + $0x10] sm:$0xff]  ;;  %v553_v20 = vmul.f32 %v549_v18, %v535_v17 }
 0x2bd   : > { %v639_v11 = vld [vmem:[#allocation3 + $0x8] sm:$0xff] }
 0x2be   : > { %966 = vrcp.f32 %v639_v11 }
 0x2bf   : > { %968 = vrcp.f32 %v640_v12 }
 0x2c3   : > { %v965_v13 = vpop.eup %964 }
 0x2c4   : > { %646 = vperm.xlu1 %944, %v965_v13  }
 0x2c8   : > { %v967_v14 = vpop.eup %966 }
 0x2c9   : > { %651 = vperm.xlu1 %944, %v967_v14   ;;  %v969_v15 = vpop.eup %968 }
 0x2cd   : > { %656 = vperm.xlu1 %944, %v969_v15  }
 0x2fb   : > { %v894_v24 = vpop.f32.mrb[0].mxu1 }
 0x2fc   : > { %v625_v25 = vadd.f32 %v894_v24, %v553_v20  ;;  %v609_v26 = vpop.f32.mrb[1].mxu1 }
 0x2fd   : > { %v623_v28 = vadd.f32 %v609_v26, %v551_v23  ;;  %v895_v29 = vpop.f32.mrb[2].mxu1 }
 0x2fe   : > { %628 = vst.msk [vmem:[#allocation4 + $0x10] sm:$0xff] %vm360_vm0, %v625_v25  ;;  %v612_v30 = vpop.f32.mrb[3].mxu1 }
 0x2ff   : > { %626 = vst.msk [vmem:[#allocation4] sm:$0xff] %vm360_vm0, %v623_v28  ;;  %v624_v31 = vadd.f32 %v612_v30, %v552_v27 }
 0x301   : > { %627 = vst.msk [vmem:[#allocation4 + $0x8] sm:$0xff] %vm360_vm0, %v624_v31 }
 0x305   : > { %v637_v40 = vld [vmem:[#allocation4 + $0x10] sm:$0xff] }
 0x306   : > { %v635_v32 = vld [vmem:[#allocation4] sm:$0xff] }
 0x308   : > { %v636_v36 = vld [vmem:[#allocation4 + $0x8] sm:$0xff] }
 0x343   : > { %v647_v33 = vpop.permute.xlu1 %646 }
 0x344   : > { %v659_v34 = vmul.f32 %v647_v33, %v635_v32 }
 0x346   : > { %v869_v35 = vpack.c.bf16 %v659_v34, %v659_v34 }
 0x348   : > { %676 = vst.msk [vmem:[%s346_s7] sm:$0xf] %vm675_vm5, %v869_v35  ;;  %v652_v37 = vpop.permute.xlu1 %651 }
 0x349   : > { %v660_v38 = vmul.f32 %v652_v37, %v636_v36 }
 0x34b   : > { %v870_v39 = vpack.c.bf16 %v660_v38, %v660_v38 }
 0x34c   : > { %v657_v41 = vpop.permute.xlu1 %656 }
 0x34d   : > { %677 = vst.msk [vmem:[%s346_s7 + $0x4] sm:$0xf] %vm675_vm5, %v870_v39  ;;  %v661_v42 = vmul.f32 %v657_v41, %v637_v40 }
 0x34f   : > { %v871_v43 = vpack.c.bf16 %v661_v42, %v661_v42 }
 0x351   : > { %678 = vst.msk [vmem:[%s346_s7 + $0x8] sm:$0xf] %vm675_vm5, %v871_v43 }
 0x352 PF: > { %s13_s16 = sadd.s32 1, %s1008_s16   ;;  %s1132_s12 = smov %s1000_s14 }
 0x353   : > { %p10_p7 = scmp.ge.s32.totalorder %s13_s16, 10   ;;  %s1133_s13 = smov %s1004_s15 }
 0x354   : > { %s1134_s14 = smov %s1137_s17  ;;  %s1135_s15 = smov %s1141_s18 }
 0x355   :  { %12 = sbr.rel (!%p10_p7) target bundleno = 3 (0x3), region = 76 }

// kernel: _lambda_.18
= control target key start
LH: loop header
LB: loop body
LE: loop exit
PB: predicated region body
PF: predicated region fallthrough
CT: control target
= control target key end

     0   :  { %vm40_vm0 = vcmask 261120   ;;  %v422_v39 = vmov 0.0   ;;  %vm423_vm1 = vmmov 0   ;;  %s518_s0 = inlined_call_operand.vmem [shape: bf16[40,32], index: 0, kind: input, shape index: {}]   ;;  %s519_s1 = inlined_call_operand.vmem [shape: bf16[32,128], index: 1, kind: input, shape index: {}]   ;;  %s520_s2 = inlined_call_operand.vmem [shape: f32[1,32], index: 2, kind: input, shape index: {}]   ;;  %s521_s3 = inlined_call_operand.vmem [shape: f32[1,32], index: 3, kind: input, shape index: {}]   ;;  %s522_s4 = inlined_call_operand.vmem [shape: f32[1,128], index: 4, kind: input, shape index: {}]   ;;  %s523_s5 = inlined_call_operand.vmem [shape: bf16[40,128], index: 5, kind: output, shape index: {}]  }
   0x1   :  { %v361_v0 = vld [vmem:[%s518_s0 + $0x8] sm:$0xff]   ;;  %v344_v1 = vld [vmem:[%s518_s0] sm:$0xff]   ;;  %v34_v5 = vld [vmem:[%s518_s0 + $0x10] sm:$0xf]  ;;  %384 = vmatprep.subr.bf16.mxu1 %v422_v39  ;;  %368 = vmatprep.subr.bf16.mxu0 %v422_v39 }
   0x2   :  { %v349_v2 = vunpack.c.l.bf16 %v361_v0  ;;  %v350_v3 = vunpack.c.h.bf16 %v361_v0  ;;  %v345_v4 = vunpack.c.l.bf16 %v344_v1  ;;  %v346_v6 = vunpack.c.h.bf16 %v344_v1  ;;  %v390_v38 = vld [vmem:[%s519_s1] sm:$0xff]   ;;  %v391_v40 = vld [vmem:[%s519_s1 + $0x8] sm:$0xff]   ;;  %376 = vmatprep.mubr.msk.bf16.mxu1 %vm423_vm1, %v422_v39  ;;  %372 = vmatprep.mubr.msk.bf16.mxu0 %vm423_vm1, %v422_v39 }
   0x3   :  { %v39_v10 = vunpack.c.l.bf16 %v34_v5  ;;  %386 = vmatpush3.bf16.msra.mxu1 %v390_v38  ;;  %369 = vmatpush3.bf16.msra.mxu0 %v390_v38  ;;  %v320_v58 = vld [vmem:[%s520_s2] ss:$0 sm:$0xff] }
   0x4   :  { %v47_v7 = vsel %vm40_vm0, %v349_v2, 0.0  ;;  %v41_v8 = vsel %vm40_vm0, %v345_v4, 0.0  ;;  %v50_v9 = vsel %vm40_vm0, %v350_v3, 0.0  ;;  %v44_v11 = vsel %vm40_vm0, %v346_v6, 0.0  ;;  %385 = vmatprep.subr.bf16.mxu1 %v422_v39  ;;  %370 = vmatprep.subr.bf16.mxu0 %v422_v39  ;;  %v321_v0 = vld [vmem:[%s521_s3] ss:$0 sm:$0xff] }
   0x5   :  { %48 = vadd.xlane.f32.xlu0 %v47_v7  ;;  %42 = vadd.xlane.f32.xlu1 %v41_v8  ;;  %v53_v12 = vsel %vm40_vm0, %v39_v10, 0.0 }
   0x7   :  { %387 = vmatpush3.bf16.msra.mxu1 %v391_v40  ;;  %371 = vmatpush3.bf16.msra.mxu0 %v391_v40 }
   0x9   :  { %51 = vadd.xlane.f32.xlu0 %v50_v9  ;;  %45 = vadd.xlane.f32.xlu1 %v44_v11 }
   0xd   :  { %54 = vadd.xlane.f32.xlu0 %v53_v12 }
  0x92   :  { %v49_v13 = vpop.xlane.xlu0 %48  ;;  %v43_v14 = vpop.xlane.xlu1 %42 }
  0x93   :  { %v59_v15 = vmul.f32 0.03125, %v49_v13  ;;  %v57_v16 = vmul.f32 0.03125, %v43_v14 }
  0x95   :  { %v468_v17 = vsub.f32 %v349_v2, %v59_v15  ;;  %v470_v18 = vsub.f32 %v345_v4, %v57_v16 }
  0x96   :  { %v52_v19 = vpop.xlane.xlu0 %51  ;;  %v46_v20 = vpop.xlane.xlu1 %45 }
  0x97   :  { %v60_v21 = vmul.f32 0.03125, %v52_v19  ;;  %v69_v22 = vmul.f32 %v468_v17, %v468_v17  ;;  %v58_v23 = vmul.f32 0.03125, %v46_v20  ;;  %v67_v24 = vmul.f32 %v470_v18, %v470_v18 }
  0x99   :  { %v65_v25 = vsub.f32 %v350_v3, %v60_v21  ;;  %v78_v26 = vsel %vm40_vm0, %v69_v22, 0.0  ;;  %v477_v27 = vsub.f32 %v346_v6, %v58_v23  ;;  %v72_v31 = vsel %vm40_vm0, %v67_v24, 0.0 }
  0x9a   :  { %v55_v28 = vpop.xlane.xlu0 %54  ;;  %79 = vadd.xlane.f32.xlu1 %v78_v26 }
  0x9b   :  { %v61_v29 = vmul.f32 0.03125, %v55_v28  ;;  %v70_v30 = vmul.f32 %v65_v25, %v65_v25  ;;  %v68_v32 = vmul.f32 %v477_v27, %v477_v27 }
  0x9d   :  { %v66_v33 = vsub.f32 %v39_v10, %v61_v29  ;;  %v81_v34 = vsel %vm40_vm0, %v70_v30, 0.0  ;;  %v75_v36 = vsel %vm40_vm0, %v68_v32, 0.0 }
  0x9e   :  { %82 = vadd.xlane.f32.xlu0 %v81_v34  ;;  %73 = vadd.xlane.f32.xlu1 %v72_v31 }
  0x9f   :  { %v71_v35 = vmul.f32 %v66_v33, %v66_v33 }
  0xa1   :  { %v84_v37 = vsel %vm40_vm0, %v71_v35, 0.0 }
  0xa2   :  { %85 = vadd.xlane.f32.xlu1 %v84_v37  ;;  %76 = vadd.xlane.f32.xlu0 %v75_v36 }
 0x127   :  { %v80_v41 = vpop.xlane.xlu1 %79 }
 0x128   :  { %v89_v42 = vmul.f32 0.03125, %v80_v41 }
 0x12a   :  { %v94_v43 = vadd.f32 1e-05, %v89_v42 }
 0x12b   :  { %v83_v44 = vpop.xlane.xlu0 %82  ;;  %v74_v45 = vpop.xlane.xlu1 %73 }
 0x12c   :  { %392 = vrsqrt.f32 %v94_v43  ;;  %v90_v46 = vmul.f32 0.03125, %v83_v44  ;;  %v87_v47 = vmul.f32 0.03125, %v74_v45 }
 0x12e   :  { %v95_v48 = vadd.f32 1e-05, %v90_v46  ;;  %v92_v49 = vadd.f32 1e-05, %v87_v47 }
 0x12f   :  { %v77_v50 = vpop.xlane.xlu0 %76  ;;  %v86_v51 = vpop.xlane.xlu1 %85 }
 0x130   :  { %394 = vrsqrt.f32 %v95_v48  ;;  %v88_v52 = vmul.f32 0.03125, %v77_v50  ;;  %v91_v53 = vmul.f32 0.03125, %v86_v51 }
 0x131   :  { %396 = vrsqrt.f32 %v92_v49 }
 0x132   :  { %v93_v54 = vadd.f32 1e-05, %v88_v52  ;;  %v96_v55 = vadd.f32 1e-05, %v91_v53 }
 0x134   :  { %398 = vrsqrt.f32 %v93_v54 }
 0x135   :  { %400 = vrsqrt.f32 %v96_v55 }
 0x136   :  { %v393_v56 = vpop.eup %392 }
 0x137   :  { %v104_v57 = vmul.f32 %v393_v56, %v468_v17  ;;  %v327_v17 = vld [vmem:[%s522_s4] ss:$0 sm:$0xff] }
 0x139   :  { %v116_v62 = vmul.f32 %v320_v58, %v104_v57 }
 0x13a   :  { %v395_v59 = vpop.eup %394 }
 0x13b   :  { %v397_v60 = vpop.eup %396  ;;  %v105_v61 = vmul.f32 %v395_v59, %v65_v25  ;;  %v128_v5 = vadd.f32 %v321_v0, %v116_v62 }
 0x13c   :  { %v102_v63 = vmul.f32 %v397_v60, %v470_v18 }
 0x13d   :  { %v117_v1 = vmul.f32 %v320_v58, %v105_v61 }
 0x13e   :  { %v399_v2 = vpop.eup %398  ;;  %v114_v7 = vmul.f32 %v320_v58, %v102_v63 }
 0x13f   :  { %v401_v3 = vpop.eup %400  ;;  %v103_v4 = vmul.f32 %v399_v2, %v477_v27  ;;  %v129_v6 = vadd.f32 %v321_v0, %v117_v1 }
 0x140   :  { %v106_v8 = vmul.f32 %v401_v3, %v66_v33  ;;  %v126_v12 = vadd.f32 %v321_v0, %v114_v7 }
 0x141   :  { %v132_v9 = vpack.c.bf16 %v129_v6, %v128_v5  ;;  %v115_v10 = vmul.f32 %v320_v58, %v103_v4 }
 0x142   :  { %v118_v11 = vmul.f32 %v320_v58, %v106_v8 }
 0x143   :  { %377 = vmatmul.mubr.msk.bf16.vlgmr.msra.gmra.mrb[0].mxu1 %vm40_vm0, %v132_v9  ;;  %v127_v13 = vadd.f32 %v321_v0, %v115_v10 }
 0x144   :  { %380 = vmatprep.mubr.msk.bf16.mxu1 %vm423_vm1, %v422_v39  ;;  %v130_v15 = vadd.f32 %v321_v0, %v118_v11 }
 0x145   :  { %v131_v14 = vpack.c.bf16 %v127_v13, %v126_v12 }
 0x146   :  { %v133_v16 = vpack.c.bf16 %v130_v15, %v130_v15 }
 0x147   :  { %373 = vmatmul.mubr.msk.bf16.vlgmr.msra.gmra.mrb[0].mxu0 %vm40_vm0, %v131_v14 }
 0x14b   :  { %381 = vmatmul.mubr.msk.bf16.gmra.mrb[4].mxu1 %vm40_vm0, %v133_v16 }
 0x216   :  { %v206_v18 = vpop.f32.mrb[0].mxu1 }
 0x217   :  { %v247_v19 = vadd.f32 %v327_v17, %v206_v18  ;;  %v378_v20 = vpop.f32.mrb[1].mxu1 }
 0x218   :  { %v209_v21 = vpop.f32.mrb[2].mxu1 }
 0x219   :  { %v330_v22 = vmul.f32 -1.702, %v247_v19  ;;  %v248_v23 = vadd.f32 %v327_v17, %v209_v21  ;;  %v379_v24 = vpop.f32.mrb[3].mxu1 }
 0x21a   :  { %v198_v25 = vpop.f32.mrb[0].mxu0 }
 0x21b   :  { %v264_v26 = vmul.f32 1.442695, %v330_v22  ;;  %v331_v27 = vmul.f32 -1.702, %v248_v23  ;;  %v245_v28 = vadd.f32 %v327_v17, %v198_v25  ;;  %v374_v29 = vpop.f32.mrb[1].mxu0 }
 0x21c   :  { %v201_v30 = vpop.f32.mrb[2].mxu0 }
 0x21d   :  { %402 = vpow2.f32 %v264_v26  ;;  %v266_v31 = vmul.f32 1.442695, %v331_v27  ;;  %v328_v32 = vmul.f32 -1.702, %v245_v28  ;;  %v246_v33 = vadd.f32 %v327_v17, %v201_v30  ;;  %v375_v34 = vpop.f32.mrb[3].mxu0 }
 0x21e   :  { %v214_v35 = vpop.f32.mrb[4].mxu1 }
 0x21f   :  { %404 = vpow2.f32 %v266_v31  ;;  %v260_v36 = vmul.f32 1.442695, %v328_v32  ;;  %v329_v37 = vmul.f32 -1.702, %v246_v33  ;;  %v249_v38 = vadd.f32 %v327_v17, %v214_v35  ;;  %v382_v39 = vpop.f32.mrb[5].mxu1 }
 0x220   :  { %v217_v40 = vpop.f32.mrb[6].mxu1 }
 0x221   :  { %406 = vpow2.f32 %v260_v36  ;;  %v262_v41 = vmul.f32 1.442695, %v329_v37  ;;  %v332_v42 = vmul.f32 -1.702, %v249_v38  ;;  %v383_v43 = vpop.f32.mrb[7].mxu1 }
 0x223   :  { %408 = vpow2.f32 %v262_v41  ;;  %v268_v44 = vmul.f32 1.442695, %v332_v42 }
 0x225   :  { %410 = vpow2.f32 %v268_v44 }
 0x227   :  { %v403_v45 = vpop.eup %402 }
 0x228   :  { %v272_v46 = vadd.f32 1.0, %v403_v45 }
 0x229   :  { %v405_v47 = vpop.eup %404 }
 0x22a   :  { %412 = vrcp.f32 %v272_v46  ;;  %v273_v48 = vadd.f32 1.0, %v405_v47 }
 0x22b   :  { %v407_v49 = vpop.eup %406 }
 0x22c   :  { %414 = vrcp.f32 %v273_v48  ;;  %v270_v50 = vadd.f32 1.0, %v407_v49 }
 0x22d   :  { %v409_v51 = vpop.eup %408 }
 0x22e   :  { %416 = vrcp.f32 %v270_v50  ;;  %v271_v52 = vadd.f32 1.0, %v409_v51 }
 0x22f   :  { %v411_v53 = vpop.eup %410 }
 0x230   :  { %418 = vrcp.f32 %v271_v52  ;;  %v274_v54 = vadd.f32 1.0, %v411_v53 }
 0x232   :  { %420 = vrcp.f32 %v274_v54 }
 0x234   :  { %v413_v55 = vpop.eup %412 }
 0x235   :  { %v287_v57 = vmul.f32 %v413_v55, %v247_v19 }
 0x236   :  { %v415_v56 = vpop.eup %414 }
 0x237   :  { %v288_v58 = vmul.f32 %v415_v56, %v248_v23 }
 0x238   :  { %v417_v59 = vpop.eup %416 }
 0x239   :  { %v359_v60 = vpack.c.bf16 %v288_v58, %v287_v57  ;;  %v285_v62 = vmul.f32 %v417_v59, %v245_v28 }
 0x23a   :  { %v419_v61 = vpop.eup %418 }
 0x23b   :  { %362 = vst [vmem:[%s523_s5 + $0x8] sm:$0xff] %v359_v60   ;;  %v286_v63 = vmul.f32 %v419_v61, %v246_v33 }
 0x23c   :  { %v421_v0 = vpop.eup %420 }
 0x23d   :  { %v354_v1 = vpack.c.bf16 %v286_v63, %v285_v62  ;;  %v289_v2 = vmul.f32 %v421_v0, %v249_v38 }
 0x23f   :  { %355 = vst [vmem:[%s523_s5] sm:$0xff] %v354_v1   ;;  %v342_v3 = vpack.c.bf16 %v289_v2, %v289_v2 }
 0x241   :  { %315 = vst [vmem:[%s523_s5 + $0x10] sm:$0xf] %v342_v3 }

// kernel: _lambda_.17
= control target key start
LH: loop header
LB: loop body
LE: loop exit
PB: predicated region body
PF: predicated region fallthrough
CT: control target
= control target key end

     0   :  { %v278_v0 = vmov 0.0   ;;  %vm279_vm0 = vmmov 0   ;;  %vm66_vm1 = vcmask 261120   ;;  %s344_s1 = inlined_call_operand.vmem [shape: bf16[32,128], index: 1, kind: input, shape index: {}]   ;;  %s345_s0 = inlined_call_operand.vmem [shape: bf16[40,32], index: 0, kind: input, shape index: {}]   ;;  %s346_s3 = inlined_call_operand.vmem [shape: bf16[40,128], index: 3, kind: input, shape index: {}]   ;;  %s347_s2 = inlined_call_operand.vmem [shape: f32[1,128], index: 2, kind: input, shape index: {}]   ;;  %s348_s4 = inlined_call_operand.vmem [shape: bf16[40,128], index: 4, kind: output, shape index: {}]  }
   0x1   :  { %267 = vmatprep.subr.bf16.mxu1 %v278_v0  ;;  %v273_v1 = vld [vmem:[%s344_s1] sm:$0xff]   ;;  %251 = vmatprep.subr.bf16.mxu0 %v278_v0  ;;  %v274_v2 = vld [vmem:[%s344_s1 + $0x8] sm:$0xff]   ;;  %v277_v5 = vld [vmem:[%s345_s0 + $0x10] ss:$0 sps:$4 sm:$0xff]  }
   0x2   :  { %259 = vmatprep.mubr.msk.bf16.mxu1 %vm279_vm0, %v278_v0  ;;  %255 = vmatprep.mubr.msk.bf16.mxu0 %vm279_vm0, %v278_v0  ;;  %v275_v3 = vld [vmem:[%s345_s0 + $0x8] sm:$0xff]   ;;  %v276_v4 = vld [vmem:[%s345_s0] sm:$0xff]   ;;  %v166_v26 = vld [vmem:[%s346_s3 + $0x10] sm:$0xf] }
   0x3   :  { %269 = vmatpush3.bf16.msra.mxu1 %v273_v1  ;;  %252 = vmatpush3.bf16.msra.mxu0 %v273_v1  ;;  %v227_v6 = vld [vmem:[%s346_s3] sm:$0xff]   ;;  %v244_v7 = vld [vmem:[%s346_s3 + $0x8] sm:$0xff]   ;;  %v171_v32 = vunpack.c.l.bf16 %v166_v26 }
   0x4   :  { %268 = vmatprep.subr.bf16.mxu1 %v278_v0  ;;  %253 = vmatprep.subr.bf16.mxu0 %v278_v0  ;;  %v215_v8 = vld [vmem:[%s347_s2] ss:$0 sm:$0xff]  ;;  %v228_v9 = vunpack.c.l.bf16 %v227_v6  ;;  %v232_v11 = vunpack.c.l.bf16 %v244_v7  ;;  %v233_v15 = vunpack.c.h.bf16 %v244_v7  ;;  %v229_v18 = vunpack.c.h.bf16 %v227_v6 }
   0x7   :  { %270 = vmatpush3.bf16.msra.mxu1 %v274_v2  ;;  %254 = vmatpush3.bf16.msra.mxu0 %v274_v2 }
   0xa   :  { %260 = vmatmul.mubr.msk.bf16.vlgmr.msra.gmra.mrb[0].mxu1 %vm66_vm1, %v275_v3  ;;  %256 = vmatmul.mubr.msk.bf16.vlgmr.msra.gmra.mrb[0].mxu0 %vm66_vm1, %v276_v4 }
   0xb   :  { %263 = vmatprep.mubr.msk.bf16.mxu1 %vm279_vm0, %v278_v0 }
  0x12   :  { %264 = vmatmul.mubr.msk.bf16.gmra.mrb[4].mxu1 %vm66_vm1, %v277_v5 }
  0xdd   :  { %v118_v10 = vpop.f32.mrb[0].mxu1  ;;  %v110_v12 = vpop.f32.mrb[0].mxu0 }
  0xde   :  { %v159_v13 = vadd.f32 %v215_v8, %v118_v10  ;;  %v261_v14 = vpop.f32.mrb[1].mxu1  ;;  %v157_v16 = vadd.f32 %v215_v8, %v110_v12  ;;  %v257_v17 = vpop.f32.mrb[1].mxu0 }
  0xdf   :  { %v121_v19 = vpop.f32.mrb[2].mxu1  ;;  %v113_v20 = vpop.f32.mrb[2].mxu0 }
  0xe0   :  { %v160_v21 = vadd.f32 %v215_v8, %v121_v19  ;;  %v172_v22 = vadd.f32 %v228_v9, %v157_v16  ;;  %v262_v23 = vpop.f32.mrb[3].mxu1  ;;  %v158_v24 = vadd.f32 %v215_v8, %v113_v20  ;;  %v258_v25 = vpop.f32.mrb[3].mxu0  ;;  %v174_v27 = vadd.f32 %v232_v11, %v159_v13 }
  0xe2   :  { %v175_v28 = vadd.f32 %v233_v15, %v160_v21  ;;  %v173_v29 = vadd.f32 %v229_v18, %v158_v24 }
  0xe4   :  { %v242_v30 = vpack.c.bf16 %v175_v28, %v174_v27  ;;  %v237_v31 = vpack.c.bf16 %v173_v29, %v172_v22 }
  0xe5   :  { %v126_v33 = vpop.f32.mrb[4].mxu1 }
  0xe6   :  { %245 = vst [vmem:[%s348_s4 + $0x8] sm:$0xff] %v242_v30   ;;  %238 = vst [vmem:[%s348_s4] sm:$0xff] %v237_v31   ;;  %v161_v34 = vadd.f32 %v215_v8, %v126_v33  ;;  %v265_v35 = vpop.f32.mrb[5].mxu1 }
  0xe7   :  { %v129_v36 = vpop.f32.mrb[6].mxu1 }
  0xe8   :  { %v176_v37 = vadd.f32 %v171_v32, %v161_v34  ;;  %v266_v38 = vpop.f32.mrb[7].mxu1 }
  0xea   :  { %v225_v39 = vpack.c.bf16 %v176_v37, %v176_v37 }
  0xec   :  { %202 = vst [vmem:[%s348_s4 + $0x10] sm:$0xf] %v225_v39 }

// kernel: _lambda_.19
= control target key start
LH: loop header
LB: loop body
LE: loop exit
PB: predicated region body
PF: predicated region fallthrough
CT: control target
= control target key end

     0   :  { %v358_v0 = vmov 0.0   ;;  %vm359_vm0 = vmmov 0   ;;  %s442_s1 = inlined_call_operand.vmem [shape: bf16[128,128], index: 1, kind: input, shape index: {}]   ;;  %s443_s0 = inlined_call_operand.vmem [shape: bf16[40,128], index: 0, kind: input, shape index: {}]   ;;  %s444_s3 = inlined_call_operand.vmem [shape: bf16[40,128], index: 3, kind: input, shape index: {}]   ;;  %s445_s2 = inlined_call_operand.vmem [shape: f32[1,128], index: 2, kind: input, shape index: {}]   ;;  %s446_s4 = inlined_call_operand.vmem [shape: bf16[40,128], index: 4, kind: output, shape index: {}]  }
   0x1   :  { %329 = vmatprep.subr.bf16.mxu1 %v358_v0  ;;  %v347_v1 = vld [vmem:[%s442_s1] sm:$0xff]   ;;  %301 = vmatprep.subr.bf16.mxu0 %v358_v0  ;;  %v348_v2 = vld [vmem:[%s442_s1 + $0x8] sm:$0xff]   ;;  %v349_v3 = vld [vmem:[%s442_s1 + $0x10] sm:$0xff]  }
   0x2   :  { %321 = vmatprep.mubr.msk.bf16.mxu1 %vm359_vm0, %v358_v0  ;;  %317 = vmatprep.mubr.msk.bf16.mxu0 %vm359_vm0, %v358_v0  ;;  %v350_v4 = vld [vmem:[%s442_s1 + $0x18] sm:$0xff]   ;;  %v351_v5 = vld [vmem:[%s442_s1 + $0x20] sm:$0xff]   ;;  %v352_v6 = vld [vmem:[%s442_s1 + $0x28] sm:$0xff]  }
   0x3   :  { %337 = vmatpush3.bf16.msra.mxu1 %v347_v1  ;;  %302 = vmatpush3.bf16.msra.mxu0 %v347_v1  ;;  %v353_v7 = vld [vmem:[%s442_s1 + $0x30] sm:$0xff]   ;;  %v354_v8 = vld [vmem:[%s442_s1 + $0x38] sm:$0xff]   ;;  %v355_v9 = vld [vmem:[%s443_s0 + $0x8] sm:$0xff]  }
   0x4   :  { %330 = vmatprep.subr.bf16.mxu1 %v358_v0  ;;  %303 = vmatprep.subr.bf16.mxu0 %v358_v0  ;;  %v356_v10 = vld [vmem:[%s443_s0] sm:$0xff]   ;;  %v357_v11 = vld [vmem:[%s443_s0 + $0x10] ss:$0 sps:$4 sm:$0xff]   ;;  %v288_v13 = vld [vmem:[%s444_s3 + $0x8] sm:$0xff]  }
   0x5   :  { %v271_v12 = vld [vmem:[%s444_s3] sm:$0xff]   ;;  %v276_v17 = vunpack.c.l.bf16 %v288_v13  ;;  %v277_v21 = vunpack.c.h.bf16 %v288_v13  ;;  %v207_v32 = vld [vmem:[%s444_s3 + $0x10] sm:$0xf] }
   0x6   :  { %v259_v14 = vld [vmem:[%s445_s2] ss:$0 sm:$0xff]  ;;  %v272_v15 = vunpack.c.l.bf16 %v271_v12  ;;  %v273_v24 = vunpack.c.h.bf16 %v271_v12  ;;  %v212_v38 = vunpack.c.l.bf16 %v207_v32 }
   0x7   :  { %338 = vmatpush3.bf16.msra.mxu1 %v348_v2  ;;  %304 = vmatpush3.bf16.msra.mxu0 %v348_v2 }
   0x8   :  { %331 = vmatprep.subr.bf16.mxu1 %v358_v0  ;;  %305 = vmatprep.subr.bf16.mxu0 %v358_v0 }
   0xb   :  { %339 = vmatpush3.bf16.msra.mxu1 %v349_v3  ;;  %306 = vmatpush3.bf16.msra.mxu0 %v349_v3 }
   0xc   :  { %332 = vmatprep.subr.bf16.mxu1 %v358_v0  ;;  %307 = vmatprep.subr.bf16.mxu0 %v358_v0 }
   0xf   :  { %340 = vmatpush3.bf16.msra.mxu1 %v350_v4  ;;  %308 = vmatpush3.bf16.msra.mxu0 %v350_v4 }
  0x10   :  { %333 = vmatprep.subr.bf16.mxu1 %v358_v0  ;;  %309 = vmatprep.subr.bf16.mxu0 %v358_v0 }
  0x13   :  { %341 = vmatpush3.bf16.msra.mxu1 %v351_v5  ;;  %310 = vmatpush3.bf16.msra.mxu0 %v351_v5 }
  0x14   :  { %334 = vmatprep.subr.bf16.mxu1 %v358_v0  ;;  %311 = vmatprep.subr.bf16.mxu0 %v358_v0 }
  0x17   :  { %342 = vmatpush3.bf16.msra.mxu1 %v352_v6  ;;  %312 = vmatpush3.bf16.msra.mxu0 %v352_v6 }
  0x18   :  { %335 = vmatprep.subr.bf16.mxu1 %v358_v0  ;;  %313 = vmatprep.subr.bf16.mxu0 %v358_v0 }
  0x1b   :  { %343 = vmatpush3.bf16.msra.mxu1 %v353_v7  ;;  %314 = vmatpush3.bf16.msra.mxu0 %v353_v7 }
  0x1c   :  { %336 = vmatprep.subr.bf16.mxu1 %v358_v0  ;;  %315 = vmatprep.subr.bf16.mxu0 %v358_v0 }
  0x1f   :  { %344 = vmatpush3.bf16.msra.mxu1 %v354_v8  ;;  %316 = vmatpush3.bf16.msra.mxu0 %v354_v8 }
  0x22   :  { %322 = vmatmul.mubr.bf16.vlgmr.msra.gmra.mrb[0].mxu1 %v355_v9  ;;  %318 = vmatmul.mubr.bf16.vlgmr.msra.gmra.mrb[0].mxu0 %v356_v10 }
  0x23   :  { %325 = vmatprep.mubr.msk.bf16.mxu1 %vm359_vm0, %v358_v0 }
  0x2a   :  { %326 = vmatmul.mubr.bf16.gmra.mrb[4].mxu1 %v357_v11 }
  0xf5   :  { %v159_v16 = vpop.f32.mrb[0].mxu1  ;;  %v151_v18 = vpop.f32.mrb[0].mxu0 }
  0xf6   :  { %v200_v19 = vadd.f32 %v259_v14, %v159_v16  ;;  %v323_v20 = vpop.f32.mrb[1].mxu1  ;;  %v198_v22 = vadd.f32 %v259_v14, %v151_v18  ;;  %v319_v23 = vpop.f32.mrb[1].mxu0 }
  0xf7   :  { %v162_v25 = vpop.f32.mrb[2].mxu1  ;;  %v154_v26 = vpop.f32.mrb[2].mxu0 }
  0xf8   :  { %v201_v27 = vadd.f32 %v259_v14, %v162_v25  ;;  %v213_v28 = vadd.f32 %v272_v15, %v198_v22  ;;  %v324_v29 = vpop.f32.mrb[3].mxu1  ;;  %v199_v30 = vadd.f32 %v259_v14, %v154_v26  ;;  %v320_v31 = vpop.f32.mrb[3].mxu0  ;;  %v215_v33 = vadd.f32 %v276_v17, %v200_v19 }
  0xfa   :  { %v216_v34 = vadd.f32 %v277_v21, %v201_v27  ;;  %v214_v35 = vadd.f32 %v273_v24, %v199_v30 }
  0xfc   :  { %v286_v36 = vpack.c.bf16 %v216_v34, %v215_v33  ;;  %v281_v37 = vpack.c.bf16 %v214_v35, %v213_v28 }
  0xfd   :  { %v167_v39 = vpop.f32.mrb[4].mxu1 }
  0xfe   :  { %289 = vst [vmem:[%s446_s4 + $0x8] sm:$0xff] %v286_v36   ;;  %282 = vst [vmem:[%s446_s4] sm:$0xff] %v281_v37   ;;  %v202_v40 = vadd.f32 %v259_v14, %v167_v39  ;;  %v327_v41 = vpop.f32.mrb[5].mxu1 }
  0xff   :  { %v170_v42 = vpop.f32.mrb[6].mxu1 }
 0x100   :  { %v217_v43 = vadd.f32 %v212_v38, %v202_v40  ;;  %v328_v44 = vpop.f32.mrb[7].mxu1 }
 0x102   :  { %v269_v45 = vpack.c.bf16 %v217_v43, %v217_v43 }
 0x104   :  { %243 = vst [vmem:[%s446_s4 + $0x10] sm:$0xf] %v269_v45 }

// kernel: _lambda_.25
= control target key start
LH: loop header
LB: loop body
LE: loop exit
PB: predicated region body
PF: predicated region fallthrough
CT: control target
= control target key end

     0   :  { %vm25_vm0 = vcmask 261120   ;;  %v150_v9 = vmov 0.0   ;;  %vm151_vm1 = vmmov 0   ;;  %s198_s0 = inlined_call_operand.vmem [shape: bf16[8,32], index: 0, kind: input, shape index: {}]   ;;  %s199_s1 = inlined_call_operand.vmem [shape: bf16[32,128], index: 1, kind: input, shape index: {}]   ;;  %s200_s2 = inlined_call_operand.vmem [shape: f32[1,32], index: 2, kind: input, shape index: {}]   ;;  %s201_s3 = inlined_call_operand.vmem [shape: f32[1,32], index: 3, kind: input, shape index: {}]   ;;  %s202_s4 = inlined_call_operand.vmem [shape: f32[8,128], index: 4, kind: output, shape index: {}]  }
   0x1   :  { %v23_v0 = vld [vmem:[%s198_s0] sm:$0xf]  ;;  %136 = vmatprep.subr.bf16.mxu0 %v150_v9  ;;  %v147_v10 = vld [vmem:[%s199_s1 + $0x8] sm:$0xff]   ;;  %140 = vmatprep.mubr.msk.bf16.mxu0 %vm151_vm1, %v150_v9 }
   0x2   :  { %v24_v1 = vunpack.c.l.bf16 %v23_v0  ;;  %v146_v8 = vld [vmem:[%s199_s1] sm:$0xff]  }
   0x3   :  { %137 = vmatpush3.bf16.msra.mxu0 %v146_v8  ;;  %v128_v15 = vld [vmem:[%s200_s2] ss:$0 sm:$0xff] }
   0x4   :  { %v26_v2 = vsel %vm25_vm0, %v24_v1, 0.0  ;;  %138 = vmatprep.subr.bf16.mxu0 %v150_v9  ;;  %v129_v17 = vld [vmem:[%s201_s3] ss:$0 sm:$0xff] }
   0x5   :  { %27 = vadd.xlane.f32.xlu0 %v26_v2 }
   0x7   :  { %139 = vmatpush3.bf16.msra.mxu0 %v147_v10 }
  0x92   :  { %v28_v3 = vpop.xlane.xlu0 %27 }
  0x93   :  { %v30_v4 = vmul.f32 0.03125, %v28_v3 }
  0x95   :  { %v31_v5 = vsub.f32 %v24_v1, %v30_v4 }
  0x97   :  { %v32_v6 = vmul.f32 %v31_v5, %v31_v5 }
  0x99   :  { %v33_v7 = vsel %vm25_vm0, %v32_v6, 0.0 }
  0x9a   :  { %34 = vadd.xlane.f32.xlu0 %v33_v7 }
 0x127   :  { %v35_v11 = vpop.xlane.xlu0 %34 }
 0x128   :  { %v36_v12 = vmul.f32 0.03125, %v35_v11 }
 0x12a   :  { %v37_v13 = vadd.f32 1e-05, %v36_v12 }
 0x12c   :  { %148 = vrsqrt.f32 %v37_v13 }
 0x136   :  { %v149_v14 = vpop.eup %148 }
 0x137   :  { %v39_v16 = vmul.f32 %v149_v14, %v31_v5 }
 0x139   :  { %v47_v18 = vmul.f32 %v128_v15, %v39_v16 }
 0x13b   :  { %v55_v19 = vadd.f32 %v129_v17, %v47_v18 }
 0x13d   :  { %v56_v20 = vpack.c.bf16 %v55_v19, %v55_v19 }
 0x13f   :  { %141 = vmatmul.mubr.msk.bf16.vlgmr.msra.gmra.mrb[0].mxu0 %vm25_vm0, %v56_v20 }
 0x212   :  { %v111_v21 = vpop.f32.mrb[0].mxu0 }
 0x213   :  { %123 = vst [vmem:[%s202_s4] sm:$0xff] %v111_v21  ;;  %v142_v22 = vpop.f32.mrb[1].mxu0 }
 0x214   :  { %v114_v23 = vpop.f32.mrb[2].mxu0 }
 0x215   :  { %v143_v24 = vpop.f32.mrb[3].mxu0 }

</bundles_post_ra>
